<compile_context>
chip_gen: v6e
topology: v6e:2x2x1
jax: 0.10.0
libtpu: 0.0.40
codegen_flags: <defaults>
</compile_context>

<pallas_src>
import math

import jax
import jax.numpy as jnp
from jax import lax
from jax.experimental import pallas as pl
from jax.experimental.pallas import tpu as pltpu


def _make_hog_kernel(C, H, W, nbins, pool):
    Hc = H // pool
    Wc = W // pool
    K = nbins * C  # stacked (bin, channel) planes, k = n*C + c

    # Sector boundary direction cosines for angles a_k = k*pi/nbins, k=1..nbins-1.
    cos_k = [float(math.cos(k * math.pi / nbins)) for k in range(1, nbins)]
    sin_k = [float(math.sin(k * math.pi / nbins)) for k in range(1, nbins)]

    def hog_kernel(xp_ref, prT_ref, pcT_ref, out_ref):
        # xp_ref : (1, C, H+2, W+2)   reflect-padded image planes
        # prT_ref: (Hc, H)            row-pooling selector (transposed)
        # pcT_ref: (Wc, W)            col-pooling selector (transposed)
        # out_ref: (1, K, Hc, Wc)     k = n*C + c, un-permuted in the wrapper
        xp = xp_ref[0]  # (C, H+2, W+2)

        # 3x3 depthwise Sobel (cross-correlation) via shifted slices.
        a = xp[:, 0:H,     0:W]
        b = xp[:, 0:H,     1:W + 1]
        c = xp[:, 0:H,     2:W + 2]
        d = xp[:, 1:H + 1, 0:W]
        f = xp[:, 1:H + 1, 2:W + 2]
        g = xp[:, 2:H + 2, 0:W]
        h = xp[:, 2:H + 2, 1:W + 1]
        i = xp[:, 2:H + 2, 2:W + 2]

        # weight_x = [[1,0,-1],[2,0,-2],[1,0,-1]], weight_y = weight_x^T
        gx = a - c + 2.0 * d - 2.0 * f + g - i
        gy = a + 2.0 * b + c - g - 2.0 * h - i

        norm = jnp.sqrt(gx * gx + gy * gy)

        # ---- comparison-based orientation binning (replaces arctan2) ----
        # bin = floor(atan2(gx, gy) / pi * nbins) mod nbins depends only on the
        # orientation mod pi.  Fold to the upper half plane (v >= 0) and count
        # which sector boundaries a_k the folded angle has passed.
        neg = gx < 0.0
        v = jnp.abs(gx)                      # y-coordinate after fold
        u = jnp.where(neg, -gy, gy)          # x-coordinate after fold
        zero_v = v == 0.0                    # theta' in {0, pi}  ->  bin 0

        # theta' >= a_k  <=>  v*cos(a_k) - u*sin(a_k) >= 0   (boundary -> upper bin,
        # exactly the floor() tie-break).
        ge = [v * ck - u * sk >= 0.0 for ck, sk in zip(cos_k, sin_k)]

        masks = [jnp.logical_or(jnp.logical_not(ge[0]), zero_v)]          # bin 0
        for n in range(1, nbins - 1):
            masks.append(jnp.logical_and(ge[n - 1], jnp.logical_not(ge[n])))
        masks.append(jnp.logical_and(ge[nbins - 2],
                                     jnp.logical_not(zero_v)))            # bin nbins-1

        # One stacked masked-magnitude tensor: (K, H, W), k = n*C + c.
        masked_all = jnp.concatenate(
            [jnp.where(m, norm, 0.0) for m in masks], axis=0)

        # ---- pool*pool cell summation as two batched MXU contractions ----
        pcT_b = jnp.broadcast_to(pcT_ref[...][None], (K, Wc, W))
        prT_b = jnp.broadcast_to(prT_ref[...][None], (K, Hc, H))

        # t1[k, v, h] = sum_w PcT[v, w] * masked[k, h, w]
        t1 = lax.dot_general(
            pcT_b, masked_all,
            dimension_numbers=(((2,), (2,)), ((0,), (0,))),
            preferred_element_type=jnp.float32)                  # (K, Wc, H)

        # hist[k, r, v] = sum_h PrT[r, h] * t1[k, v, h]
        hist = lax.dot_general(
            prT_b, t1,
            dimension_numbers=(((2,), (2,)), ((0,), (0,))),
            preferred_element_type=jnp.float32)                  # (K, Hc, Wc)

        # ---- L2 normalize over the bin axis (F.normalize, eps=1e-12) ----
        ss = jnp.zeros((C, Hc, Wc), jnp.float32)
        for n in range(nbins):
            blk = hist[n * C:(n + 1) * C]
            ss = ss + blk * blk
        # 1 / max(sqrt(ss), 1e-12) == rsqrt(max(ss, 1e-24))
        inv = lax.rsqrt(jnp.maximum(ss, 1e-24))                  # (C, Hc, Wc)
        inv_full = jnp.concatenate([inv] * nbins, axis=0)        # (K, Hc, Wc)

        out_ref[0] = hist * inv_full

    return hog_kernel


def hog_layer_c(x, nbins=9, pool=7):
    """x: (B, 3, H, W) float32 -> (B, 3, nbins, H//pool, W//pool) float32."""
    B, C, H, W = x.shape
    Hc, Wc = H // pool, W // pool
    K = nbins * C

    # Reflect pad (matches F.pad(mode='reflect') with pad=1).
    xp = jnp.pad(x, ((0, 0), (0, 0), (1, 1), (1, 1)), mode="reflect")
    Hp, Wp = H + 2, W + 2

    # 0/1 pooling selector matrices, built once, passed in pre-transposed.
    h_idx = jnp.arange(H)
    prT = (((h_idx[None, :] // pool) == jnp.arange(Hc)[:, None])
           & (h_idx[None, :] < Hc * pool)).astype(jnp.float32)       # (Hc, H)
    w_idx = jnp.arange(W)
    pcT = (((w_idx[None, :] // pool) == jnp.arange(Wc)[:, None])
           & (w_idx[None, :] < Wc * pool)).astype(jnp.float32)       # (Wc, W)

    kernel = _make_hog_kernel(C, H, W, nbins, pool)

    cost = pl.CostEstimate(
        flops=int(B * (50 * C * H * W + 2 * K * Wc * W * H + 2 * K * Hc * H * Wc)),
        transcendentals=int(B * (C * H * W + C * Hc * Wc)),
        bytes_accessed=int(B * (C * Hp * Wp + K * Hc * Wc) * 4
                           + (Hc * H + Wc * W) * 4),
    )

    out_flat = pl.pallas_call(
        kernel,
        out_shape=jax.ShapeDtypeStruct((B, K, Hc, Wc), jnp.float32),
        grid_spec=pltpu.PrefetchScalarGridSpec(
            num_scalar_prefetch=0,
            grid=(B,),
            in_specs=[
                pl.BlockSpec((1, C, Hp, Wp), lambda bi: (bi, 0, 0, 0)),
                pl.BlockSpec((Hc, H), lambda bi: (0, 0)),
                pl.BlockSpec((Wc, W), lambda bi: (0, 0)),
            ],
            out_specs=pl.BlockSpec((1, K, Hc, Wc), lambda bi: (bi, 0, 0, 0)),
        ),
        compiler_params=pltpu.CompilerParams(
            dimension_semantics=("parallel",),
            vmem_limit_bytes=32 * 1024 * 1024,
        ),
        cost_estimate=cost,
    )(xp, prT, pcT)

    # k = n*C + c  ->  (B, nbins, C, Hc, Wc)  ->  (B, C, nbins, Hc, Wc)
    return out_flat.reshape(B, nbins, C, Hc, Wc).transpose(0, 2, 1, 3, 4)


def hog_layer_c_ref(x, nbins=9, pool=7):
    """Pure-JAX reference mirroring the PyTorch forward, for validation."""
    B, C, H, W = x.shape
    Hc, Wc = H // pool, W // pool
    xp = jnp.pad(x, ((0, 0), (0, 0), (1, 1), (1, 1)), mode="reflect")
    wx = jnp.array([[1.0, 0.0, -1.0], [2.0, 0.0, -2.0], [1.0, 0.0, -1.0]],
                   jnp.float32)
    wy = wx.T

    def dwconv(img, w):
        out = jnp.zeros((B, C, H, W), jnp.float32)
        for di in range(3):
            for dj in range(3):
                out = out + w[di, dj] * img[:, :, di:di + H, dj:dj + W]
        return out

    gx = dwconv(xp, wx)
    gy = dwconv(xp, wy)
    norm = jnp.sqrt(gx * gx + gy * gy)
    phase = jnp.arctan2(gx, gy) / math.pi * nbins
    bins = jnp.mod(jnp.floor(phase).astype(jnp.int32), nbins)
    onehot = (bins[:, :, None, :, :]
              == jnp.arange(nbins)[None, None, :, None, None]).astype(jnp.float32)
    hist = onehot * norm[:, :, None, :, :]
    hist = hist[:, :, :, : Hc * pool, : Wc * pool]
    hist = hist.reshape(B, C, nbins, Hc, pool, Wc, pool).sum(axis=(4, 6))
    denom = jnp.maximum(jnp.sqrt(jnp.sum(hist * hist, axis=2, keepdims=True)),
                        1e-12)
    return hist / denom


if __name__ == "__main__":
    key = jax.random.PRNGKey(0)
    B, C, H, W = 2, 3, 14, 14          # 3 channels (RGB); pool=7 -> 2x2 cells
    x = jax.random.normal(key, (B, C, H, W), dtype=jnp.float32)

    out = hog_layer_c(x, nbins=9, pool=7)
    out = jax.block_until_ready(out)

    ref = hog_layer_c_ref(x, nbins=9, pool=7)
    assert out.shape == (B, C, 9, H // 7, W // 7)
    assert jnp.allclose(out, ref, atol=1e-5, rtol=1e-5), "mismatch vs reference"

    print("KERNEL_OK")
</pallas_src>

<mosaic_0001>
module attributes {stable_mosaic.version = 11 : i64} {
  func.func @hog_kernel(%arg0: i32, %arg1: memref<1x3x16x16xf32, #tpu.memory_space<vmem>>, %arg2: memref<2x14xf32, #tpu.memory_space<vmem>>, %arg3: memref<2x14xf32, #tpu.memory_space<vmem>>, %arg4: memref<1x27x2x2xf32, #tpu.memory_space<vmem>>) attributes {dimension_semantics = [#tpu.dimension_semantics<parallel>], iteration_bounds = array<i64: 2>, scalar_prefetch = 0 : i64, scratch_operands = 0 : i64, tpu.core_type = #tpu.core_type<tc>, window_params = [{transform_indices = @transform_0, window_bounds = array<i64: 1, 3, 16, 16>}, {pipeline_mode = #tpu.pipeline_mode<synchronous>, transform_indices = @transform_1, window_bounds = array<i64: 2, 14>}, {pipeline_mode = #tpu.pipeline_mode<synchronous>, transform_indices = @transform_2, window_bounds = array<i64: 2, 14>}, {transform_indices = @transform_3, window_bounds = array<i64: 1, 27, 2, 2>}]} {
    %c0 = arith.constant 0 : index
    %c0_0 = arith.constant 0 : index
    %c0_1 = arith.constant 0 : index
    %c0_2 = arith.constant 0 : index
    %0 = vector.load %arg1[%c0, %c0_0, %c0_1, %c0_2] : memref<1x3x16x16xf32, #tpu.memory_space<vmem>>, vector<1x3x16x16xf32>
    %1 = vector.shape_cast %0 : vector<1x3x16x16xf32> to vector<3x16x16xf32>
    %2 = vector.extract_strided_slice %1 {offsets = [0, 0, 0], sizes = [3, 14, 14], strides = [1, 1, 1]} : vector<3x16x16xf32> to vector<3x14x14xf32>
    %3 = vector.extract_strided_slice %1 {offsets = [0, 0, 1], sizes = [3, 14, 14], strides = [1, 1, 1]} : vector<3x16x16xf32> to vector<3x14x14xf32>
    %4 = vector.extract_strided_slice %1 {offsets = [0, 0, 2], sizes = [3, 14, 14], strides = [1, 1, 1]} : vector<3x16x16xf32> to vector<3x14x14xf32>
    %5 = vector.extract_strided_slice %1 {offsets = [0, 1, 0], sizes = [3, 14, 14], strides = [1, 1, 1]} : vector<3x16x16xf32> to vector<3x14x14xf32>
    %6 = vector.extract_strided_slice %1 {offsets = [0, 1, 2], sizes = [3, 14, 14], strides = [1, 1, 1]} : vector<3x16x16xf32> to vector<3x14x14xf32>
    %7 = vector.extract_strided_slice %1 {offsets = [0, 2, 0], sizes = [3, 14, 14], strides = [1, 1, 1]} : vector<3x16x16xf32> to vector<3x14x14xf32>
    %8 = vector.extract_strided_slice %1 {offsets = [0, 2, 1], sizes = [3, 14, 14], strides = [1, 1, 1]} : vector<3x16x16xf32> to vector<3x14x14xf32>
    %9 = vector.extract_strided_slice %1 {offsets = [0, 2, 2], sizes = [3, 14, 14], strides = [1, 1, 1]} : vector<3x16x16xf32> to vector<3x14x14xf32>
    %10 = arith.subf %2, %4 : vector<3x14x14xf32>
    %cst = arith.constant 2.000000e+00 : f32
    %11 = vector.broadcast %cst : f32 to vector<3x14x14xf32>
    %12 = arith.mulf %11, %5 : vector<3x14x14xf32>
    %13 = arith.addf %10, %12 : vector<3x14x14xf32>
    %cst_3 = arith.constant 2.000000e+00 : f32
    %14 = vector.broadcast %cst_3 : f32 to vector<3x14x14xf32>
    %15 = arith.mulf %14, %6 : vector<3x14x14xf32>
    %16 = arith.subf %13, %15 : vector<3x14x14xf32>
    %17 = arith.addf %16, %7 : vector<3x14x14xf32>
    %18 = arith.subf %17, %9 : vector<3x14x14xf32>
    %cst_4 = arith.constant 2.000000e+00 : f32
    %19 = vector.broadcast %cst_4 : f32 to vector<3x14x14xf32>
    %20 = arith.mulf %19, %3 : vector<3x14x14xf32>
    %21 = arith.addf %2, %20 : vector<3x14x14xf32>
    %22 = arith.addf %21, %4 : vector<3x14x14xf32>
    %23 = arith.subf %22, %7 : vector<3x14x14xf32>
    %cst_5 = arith.constant 2.000000e+00 : f32
    %24 = vector.broadcast %cst_5 : f32 to vector<3x14x14xf32>
    %25 = arith.mulf %24, %8 : vector<3x14x14xf32>
    %26 = arith.subf %23, %25 : vector<3x14x14xf32>
    %27 = arith.subf %26, %9 : vector<3x14x14xf32>
    %28 = arith.mulf %18, %18 : vector<3x14x14xf32>
    %29 = arith.mulf %27, %27 : vector<3x14x14xf32>
    %30 = arith.addf %28, %29 : vector<3x14x14xf32>
    %31 = math.sqrt %30 : vector<3x14x14xf32>
    %cst_6 = arith.constant 0.000000e+00 : f32
    %32 = vector.broadcast %cst_6 : f32 to vector<3x14x14xf32>
    %33 = arith.cmpf olt, %18, %32 : vector<3x14x14xf32>
    %34 = math.absf %18 : vector<3x14x14xf32>
    %cst_7 = arith.constant 0.000000e+00 : f32
    %35 = vector.broadcast %cst_7 : f32 to vector<3x14x14xf32>
    %36 = arith.subf %35, %27 : vector<3x14x14xf32>
    %37 = arith.select %33, %36, %27 : vector<3x14x14xi1>, vector<3x14x14xf32>
    %cst_8 = arith.constant 0.000000e+00 : f32
    %38 = vector.broadcast %cst_8 : f32 to vector<3x14x14xf32>
    %39 = arith.cmpf oeq, %34, %38 : vector<3x14x14xf32>
    %cst_9 = arith.constant 0.939692616 : f32
    %40 = vector.broadcast %cst_9 : f32 to vector<3x14x14xf32>
    %41 = arith.mulf %34, %40 : vector<3x14x14xf32>
    %cst_10 = arith.constant 0.342020154 : f32
    %42 = vector.broadcast %cst_10 : f32 to vector<3x14x14xf32>
    %43 = arith.mulf %37, %42 : vector<3x14x14xf32>
    %44 = arith.subf %41, %43 : vector<3x14x14xf32>
    %cst_11 = arith.constant 0.000000e+00 : f32
    %45 = vector.broadcast %cst_11 : f32 to vector<3x14x14xf32>
    %46 = arith.cmpf oge, %44, %45 : vector<3x14x14xf32>
    %cst_12 = arith.constant 0.766044437 : f32
    %47 = vector.broadcast %cst_12 : f32 to vector<3x14x14xf32>
    %48 = arith.mulf %34, %47 : vector<3x14x14xf32>
    %cst_13 = arith.constant 0.642787635 : f32
    %49 = vector.broadcast %cst_13 : f32 to vector<3x14x14xf32>
    %50 = arith.mulf %37, %49 : vector<3x14x14xf32>
    %51 = arith.subf %48, %50 : vector<3x14x14xf32>
    %cst_14 = arith.constant 0.000000e+00 : f32
    %52 = vector.broadcast %cst_14 : f32 to vector<3x14x14xf32>
    %53 = arith.cmpf oge, %51, %52 : vector<3x14x14xf32>
    %cst_15 = arith.constant 5.000000e-01 : f32
    %54 = vector.broadcast %cst_15 : f32 to vector<3x14x14xf32>
    %55 = arith.mulf %34, %54 : vector<3x14x14xf32>
    %cst_16 = arith.constant 0.866025388 : f32
    %56 = vector.broadcast %cst_16 : f32 to vector<3x14x14xf32>
    %57 = arith.mulf %37, %56 : vector<3x14x14xf32>
    %58 = arith.subf %55, %57 : vector<3x14x14xf32>
    %cst_17 = arith.constant 0.000000e+00 : f32
    %59 = vector.broadcast %cst_17 : f32 to vector<3x14x14xf32>
    %60 = arith.cmpf oge, %58, %59 : vector<3x14x14xf32>
    %cst_18 = arith.constant 0.173648179 : f32
    %61 = vector.broadcast %cst_18 : f32 to vector<3x14x14xf32>
    %62 = arith.mulf %34, %61 : vector<3x14x14xf32>
    %cst_19 = arith.constant 0.984807729 : f32
    %63 = vector.broadcast %cst_19 : f32 to vector<3x14x14xf32>
    %64 = arith.mulf %37, %63 : vector<3x14x14xf32>
    %65 = arith.subf %62, %64 : vector<3x14x14xf32>
    %cst_20 = arith.constant 0.000000e+00 : f32
    %66 = vector.broadcast %cst_20 : f32 to vector<3x14x14xf32>
    %67 = arith.cmpf oge, %65, %66 : vector<3x14x14xf32>
    %cst_21 = arith.constant -0.173648179 : f32
    %68 = vector.broadcast %cst_21 : f32 to vector<3x14x14xf32>
    %69 = arith.mulf %34, %68 : vector<3x14x14xf32>
    %cst_22 = arith.constant 0.984807729 : f32
    %70 = vector.broadcast %cst_22 : f32 to vector<3x14x14xf32>
    %71 = arith.mulf %37, %70 : vector<3x14x14xf32>
    %72 = arith.subf %69, %71 : vector<3x14x14xf32>
    %cst_23 = arith.constant 0.000000e+00 : f32
    %73 = vector.broadcast %cst_23 : f32 to vector<3x14x14xf32>
    %74 = arith.cmpf oge, %72, %73 : vector<3x14x14xf32>
    %cst_24 = arith.constant -5.000000e-01 : f32
    %75 = vector.broadcast %cst_24 : f32 to vector<3x14x14xf32>
    %76 = arith.mulf %34, %75 : vector<3x14x14xf32>
    %cst_25 = arith.constant 0.866025388 : f32
    %77 = vector.broadcast %cst_25 : f32 to vector<3x14x14xf32>
    %78 = arith.mulf %37, %77 : vector<3x14x14xf32>
    %79 = arith.subf %76, %78 : vector<3x14x14xf32>
    %cst_26 = arith.constant 0.000000e+00 : f32
    %80 = vector.broadcast %cst_26 : f32 to vector<3x14x14xf32>
    %81 = arith.cmpf oge, %79, %80 : vector<3x14x14xf32>
    %cst_27 = arith.constant -0.766044437 : f32
    %82 = vector.broadcast %cst_27 : f32 to vector<3x14x14xf32>
    %83 = arith.mulf %34, %82 : vector<3x14x14xf32>
    %cst_28 = arith.constant 0.642787635 : f32
    %84 = vector.broadcast %cst_28 : f32 to vector<3x14x14xf32>
    %85 = arith.mulf %37, %84 : vector<3x14x14xf32>
    %86 = arith.subf %83, %85 : vector<3x14x14xf32>
    %cst_29 = arith.constant 0.000000e+00 : f32
    %87 = vector.broadcast %cst_29 : f32 to vector<3x14x14xf32>
    %88 = arith.cmpf oge, %86, %87 : vector<3x14x14xf32>
    %cst_30 = arith.constant -0.939692616 : f32
    %89 = vector.broadcast %cst_30 : f32 to vector<3x14x14xf32>
    %90 = arith.mulf %34, %89 : vector<3x14x14xf32>
    %cst_31 = arith.constant 0.342020154 : f32
    %91 = vector.broadcast %cst_31 : f32 to vector<3x14x14xf32>
    %92 = arith.mulf %37, %91 : vector<3x14x14xf32>
    %93 = arith.subf %90, %92 : vector<3x14x14xf32>
    %cst_32 = arith.constant 0.000000e+00 : f32
    %94 = vector.broadcast %cst_32 : f32 to vector<3x14x14xf32>
    %95 = arith.cmpf oge, %93, %94 : vector<3x14x14xf32>
    %cst_33 = arith.constant dense<true> : vector<3x14x14xi1>
    %96 = arith.xori %46, %cst_33 : vector<3x14x14xi1>
    %97 = arith.ori %96, %39 : vector<3x14x14xi1>
    %cst_34 = arith.constant dense<true> : vector<3x14x14xi1>
    %98 = arith.xori %53, %cst_34 : vector<3x14x14xi1>
    %99 = arith.andi %46, %98 : vector<3x14x14xi1>
    %cst_35 = arith.constant dense<true> : vector<3x14x14xi1>
    %100 = arith.xori %60, %cst_35 : vector<3x14x14xi1>
    %101 = arith.andi %53, %100 : vector<3x14x14xi1>
    %cst_36 = arith.constant dense<true> : vector<3x14x14xi1>
    %102 = arith.xori %67, %cst_36 : vector<3x14x14xi1>
    %103 = arith.andi %60, %102 : vector<3x14x14xi1>
    %cst_37 = arith.constant dense<true> : vector<3x14x14xi1>
    %104 = arith.xori %74, %cst_37 : vector<3x14x14xi1>
    %105 = arith.andi %67, %104 : vector<3x14x14xi1>
    %cst_38 = arith.constant dense<true> : vector<3x14x14xi1>
    %106 = arith.xori %81, %cst_38 : vector<3x14x14xi1>
    %107 = arith.andi %74, %106 : vector<3x14x14xi1>
    %cst_39 = arith.constant dense<true> : vector<3x14x14xi1>
    %108 = arith.xori %88, %cst_39 : vector<3x14x14xi1>
    %109 = arith.andi %81, %108 : vector<3x14x14xi1>
    %cst_40 = arith.constant dense<true> : vector<3x14x14xi1>
    %110 = arith.xori %95, %cst_40 : vector<3x14x14xi1>
    %111 = arith.andi %88, %110 : vector<3x14x14xi1>
    %cst_41 = arith.constant dense<true> : vector<3x14x14xi1>
    %112 = arith.xori %39, %cst_41 : vector<3x14x14xi1>
    %113 = arith.andi %95, %112 : vector<3x14x14xi1>
    %cst_42 = arith.constant 0.000000e+00 : f32
    %114 = vector.broadcast %cst_42 : f32 to vector<3x14x14xf32>
    %115 = arith.select %97, %31, %114 : vector<3x14x14xi1>, vector<3x14x14xf32>
    %cst_43 = arith.constant 0.000000e+00 : f32
    %116 = vector.broadcast %cst_43 : f32 to vector<3x14x14xf32>
    %117 = arith.select %99, %31, %116 : vector<3x14x14xi1>, vector<3x14x14xf32>
    %cst_44 = arith.constant 0.000000e+00 : f32
    %118 = vector.broadcast %cst_44 : f32 to vector<3x14x14xf32>
    %119 = arith.select %101, %31, %118 : vector<3x14x14xi1>, vector<3x14x14xf32>
    %cst_45 = arith.constant 0.000000e+00 : f32
    %120 = vector.broadcast %cst_45 : f32 to vector<3x14x14xf32>
    %121 = arith.select %103, %31, %120 : vector<3x14x14xi1>, vector<3x14x14xf32>
    %cst_46 = arith.constant 0.000000e+00 : f32
    %122 = vector.broadcast %cst_46 : f32 to vector<3x14x14xf32>
    %123 = arith.select %105, %31, %122 : vector<3x14x14xi1>, vector<3x14x14xf32>
    %cst_47 = arith.constant 0.000000e+00 : f32
    %124 = vector.broadcast %cst_47 : f32 to vector<3x14x14xf32>
    %125 = arith.select %107, %31, %124 : vector<3x14x14xi1>, vector<3x14x14xf32>
    %cst_48 = arith.constant 0.000000e+00 : f32
    %126 = vector.broadcast %cst_48 : f32 to vector<3x14x14xf32>
    %127 = arith.select %109, %31, %126 : vector<3x14x14xi1>, vector<3x14x14xf32>
    %cst_49 = arith.constant 0.000000e+00 : f32
    %128 = vector.broadcast %cst_49 : f32 to vector<3x14x14xf32>
    %129 = arith.select %111, %31, %128 : vector<3x14x14xi1>, vector<3x14x14xf32>
    %cst_50 = arith.constant 0.000000e+00 : f32
    %130 = vector.broadcast %cst_50 : f32 to vector<3x14x14xf32>
    %131 = arith.select %113, %31, %130 : vector<3x14x14xi1>, vector<3x14x14xf32>
    %132 = tpu.concatenate %115, %117, %119, %121, %123, %125, %127, %129, %131 in 0 : vector<3x14x14xf32>, vector<3x14x14xf32>, vector<3x14x14xf32>, vector<3x14x14xf32>, vector<3x14x14xf32>, vector<3x14x14xf32>, vector<3x14x14xf32>, vector<3x14x14xf32>, vector<3x14x14xf32> -> vector<27x14x14xf32>
    %c0_51 = arith.constant 0 : index
    %c0_52 = arith.constant 0 : index
    %133 = vector.load %arg3[%c0_51, %c0_52] : memref<2x14xf32, #tpu.memory_space<vmem>>, vector<2x14xf32>
    %134 = vector.shape_cast %133 : vector<2x14xf32> to vector<1x2x14xf32>
    %135 = vector.shape_cast %134 : vector<1x2x14xf32> to vector<1x2x14xf32>
    %136 = vector.broadcast %135 : vector<1x2x14xf32> to vector<27x2x14xf32>
    %c0_53 = arith.constant 0 : index
    %c0_54 = arith.constant 0 : index
    %137 = vector.load %arg2[%c0_53, %c0_54] : memref<2x14xf32, #tpu.memory_space<vmem>>, vector<2x14xf32>
    %138 = vector.shape_cast %137 : vector<2x14xf32> to vector<1x2x14xf32>
    %139 = vector.shape_cast %138 : vector<1x2x14xf32> to vector<1x2x14xf32>
    %140 = vector.broadcast %139 : vector<1x2x14xf32> to vector<27x2x14xf32>
    %cst_55 = arith.constant dense<0.000000e+00> : vector<27x2x14xf32>
    %141 = tpu.matmul %136, %132, %cst_55 {dimension_numbers = #tpu.dot_dimension_numbers<[2], [2], [1], [1], [0, 0, 0, 1, 1, 1], [0], [0]>} : vector<27x2x14xf32>, vector<27x14x14xf32>, vector<27x2x14xf32> -> vector<27x2x14xf32>
    %cst_56 = arith.constant dense<0.000000e+00> : vector<27x2x2xf32>
    %142 = tpu.matmul %140, %141, %cst_56 {dimension_numbers = #tpu.dot_dimension_numbers<[2], [2], [1], [1], [0, 0, 0, 1, 1, 1], [0], [0]>} : vector<27x2x14xf32>, vector<27x2x14xf32>, vector<27x2x2xf32> -> vector<27x2x2xf32>
    %cst_57 = arith.constant 0.000000e+00 : f32
    %143 = vector.broadcast %cst_57 : f32 to vector<3x2x2xf32>
    %144 = vector.extract_strided_slice %142 {offsets = [0, 0, 0], sizes = [3, 2, 2], strides = [1, 1, 1]} : vector<27x2x2xf32> to vector<3x2x2xf32>
    %145 = arith.mulf %144, %144 : vector<3x2x2xf32>
    %146 = arith.addf %143, %145 : vector<3x2x2xf32>
    %147 = vector.extract_strided_slice %142 {offsets = [3, 0, 0], sizes = [3, 2, 2], strides = [1, 1, 1]} : vector<27x2x2xf32> to vector<3x2x2xf32>
    %148 = arith.mulf %147, %147 : vector<3x2x2xf32>
    %149 = arith.addf %146, %148 : vector<3x2x2xf32>
    %150 = vector.extract_strided_slice %142 {offsets = [6, 0, 0], sizes = [3, 2, 2], strides = [1, 1, 1]} : vector<27x2x2xf32> to vector<3x2x2xf32>
    %151 = arith.mulf %150, %150 : vector<3x2x2xf32>
    %152 = arith.addf %149, %151 : vector<3x2x2xf32>
    %153 = vector.extract_strided_slice %142 {offsets = [9, 0, 0], sizes = [3, 2, 2], strides = [1, 1, 1]} : vector<27x2x2xf32> to vector<3x2x2xf32>
    %154 = arith.mulf %153, %153 : vector<3x2x2xf32>
    %155 = arith.addf %152, %154 : vector<3x2x2xf32>
    %156 = vector.extract_strided_slice %142 {offsets = [12, 0, 0], sizes = [3, 2, 2], strides = [1, 1, 1]} : vector<27x2x2xf32> to vector<3x2x2xf32>
    %157 = arith.mulf %156, %156 : vector<3x2x2xf32>
    %158 = arith.addf %155, %157 : vector<3x2x2xf32>
    %159 = vector.extract_strided_slice %142 {offsets = [15, 0, 0], sizes = [3, 2, 2], strides = [1, 1, 1]} : vector<27x2x2xf32> to vector<3x2x2xf32>
    %160 = arith.mulf %159, %159 : vector<3x2x2xf32>
    %161 = arith.addf %158, %160 : vector<3x2x2xf32>
    %162 = vector.extract_strided_slice %142 {offsets = [18, 0, 0], sizes = [3, 2, 2], strides = [1, 1, 1]} : vector<27x2x2xf32> to vector<3x2x2xf32>
    %163 = arith.mulf %162, %162 : vector<3x2x2xf32>
    %164 = arith.addf %161, %163 : vector<3x2x2xf32>
    %165 = vector.extract_strided_slice %142 {offsets = [21, 0, 0], sizes = [3, 2, 2], strides = [1, 1, 1]} : vector<27x2x2xf32> to vector<3x2x2xf32>
    %166 = arith.mulf %165, %165 : vector<3x2x2xf32>
    %167 = arith.addf %164, %166 : vector<3x2x2xf32>
    %168 = vector.extract_strided_slice %142 {offsets = [24, 0, 0], sizes = [3, 2, 2], strides = [1, 1, 1]} : vector<27x2x2xf32> to vector<3x2x2xf32>
    %169 = arith.mulf %168, %168 : vector<3x2x2xf32>
    %170 = arith.addf %167, %169 : vector<3x2x2xf32>
    %cst_58 = arith.constant 1.000000e-24 : f32
    %171 = vector.broadcast %cst_58 : f32 to vector<3x2x2xf32>
    %172 = arith.maximumf %170, %171 : vector<3x2x2xf32>
    %173 = math.rsqrt %172 : vector<3x2x2xf32>
    %174 = tpu.concatenate %173, %173, %173, %173, %173, %173, %173, %173, %173 in 0 : vector<3x2x2xf32>, vector<3x2x2xf32>, vector<3x2x2xf32>, vector<3x2x2xf32>, vector<3x2x2xf32>, vector<3x2x2xf32>, vector<3x2x2xf32>, vector<3x2x2xf32>, vector<3x2x2xf32> -> vector<27x2x2xf32>
    %175 = arith.mulf %142, %174 : vector<27x2x2xf32>
    %c0_59 = arith.constant 0 : index
    %c0_60 = arith.constant 0 : index
    %c0_61 = arith.constant 0 : index
    %c0_62 = arith.constant 0 : index
    %176 = vector.load %arg4[%c0_59, %c0_60, %c0_61, %c0_62] : memref<1x27x2x2xf32, #tpu.memory_space<vmem>>, vector<1x27x2x2xf32>
    %177 = vector.shape_cast %176 : vector<1x27x2x2xf32> to vector<27x2x2xf32>
    %178 = vector.shape_cast %175 : vector<27x2x2xf32> to vector<1x27x2x2xf32>
    tpu.vector_store %arg4[%c0_59, %c0_60, %c0_61, %c0_62], %178 {strides = array<i32>} : memref<1x27x2x2xf32, #tpu.memory_space<vmem>>, vector<1x27x2x2xf32>,
    return
  }
  func.func @transform_0(%arg0: i32) -> (i32, i32, i32, i32) {
    %c0_i32 = arith.constant 0 : i32
    %c0_i32_0 = arith.constant 0 : i32
    %c0_i32_1 = arith.constant 0 : i32
    %c0_i32_2 = arith.constant 0 : i32
    return %arg0, %c0_i32, %c0_i32_0, %c0_i32_1 : i32, i32, i32, i32
  }
  func.func @transform_1(%arg0: i32) -> (i32, i32) {
    %c0_i32 = arith.constant 0 : i32
    %c0_i32_0 = arith.constant 0 : i32
    %c0_i32_1 = arith.constant 0 : i32
    return %c0_i32, %c0_i32_0 : i32, i32
  }
  func.func @transform_2(%arg0: i32) -> (i32, i32) {
    %c0_i32 = arith.constant 0 : i32
    %c0_i32_0 = arith.constant 0 : i32
    %c0_i32_1 = arith.constant 0 : i32
    return %c0_i32, %c0_i32_0 : i32, i32
  }
  func.func @transform_3(%arg0: i32) -> (i32, i32, i32, i32) {
    %c0_i32 = arith.constant 0 : i32
    %c0_i32_0 = arith.constant 0 : i32
    %c0_i32_1 = arith.constant 0 : i32
    %c0_i32_2 = arith.constant 0 : i32
    return %arg0, %c0_i32, %c0_i32_0, %c0_i32_1 : i32, i32, i32, i32
  }
}

</mosaic_0001>

<bundles_post_ra>
// kernel: tpu_custom_call.1
= control target key start
LH: loop header
LB: loop body
LE: loop exit
PB: predicated region body
PF: predicated region fallthrough
CT: control target
= control target key end

     0   :  { %8 = vsyncpa [#allocation3], 0  ;;  %s7985_s0 = inlined_call_operand.hbm [shape: f32[2,3,16,16], index: 0, kind: input, shape index: {}]   ;;  %s7986_s1 = inlined_call_operand.hbm [shape: f32[2,14], index: 1, kind: input, shape index: {}]   ;;  %s7987_s2 = inlined_call_operand.vmem [shape: f32[2,14], index: 2, kind: input, shape index: {}]   ;;  %s7988_s3 = inlined_call_operand.vmem [shape: f32[2,27,2,2], index: 3, kind: output, shape index: {}]  }
   0x1   :  { %10 = vsyncpa [#allocation3 + $0x1], 0 }
   0x2   :  { %11 = vsyncpa [#allocation5], 0  ;;  %s5869_s12 = smov 0   ;;  %s5871_s13 = smov 0  }
   0x3   :  { %s5873_s14 = smov 0   ;;  %s5875_s15 = smov 0  }
   0x4 LB: > { %s5888_s16 = sadd.s32 4294967295, %s5838_s15   ;;  %s5891_s17 = sadd.s32 1, %s5838_s15   ;;  %s5838_s15 = sphi %s5875_s15, %s8466_s15   ;;  %s5834_s14 = sphi %s5873_s14, %s8465_s14   ;;  %s5830_s13 = sphi %s5871_s13, %s8464_s13   ;;  %s5826_s12 = sphi %s5869_s12, %s8463_s12  }
   0x5   : > { %s21_s18 = ssub.s32 %s5838_s15, %s5891_s17  ;;  %s24_s19 = sadd.s32 1, %s5834_s14 }
   0x6   : > { %p22_p0 = scmp.eq.s32.totalorder %s21_s18, 0  ;;  %p31_p1 = scmp.ne.s32.totalorder %s5834_s14, %s5830_s13 }
   0x7   : > { %p32_p2 = scmp.eq.s32.totalorder %s5838_s15, 0  ;;  %p37_p3 = scmp.ne.s32.totalorder %s5830_s13, %s5826_s12 }
   0x8   : > { %s5901_s20 = scalar_select %p22_p0, %s5834_s14, %s24_s19  }
   0x9   : > { %p5903_p4 = por %p32_p2, %p31_p1  ;;  %p7989_p5 = scmp.eq.s32.totalorder %s5888_s16, 0 }
   0xa   : > { %p5064_p6 = scmp.ge.s32.totalorder %s5838_s15, 1  ;;  %p116_p7 = scmp.lt.s32.totalorder %s5838_s15, 3 }
   0xb   : > { %p5912_p8 = por %p7989_p5, %p37_p3  ;;  %s5840_s24 = smov [#allocation4]  }
   0xc   : > { %p5916_p9 = pnand %p5064_p6, %p116_p7  ;;  %s129_s25 = sshll.u32 %s5840_s24, 4  ;;  %s130_s25 = int_to_ptr.vmem [resolvable:$true] %s129_s25 }
   0xd   : > { %s8057_s22 = scalar_select %p5912_p8, 1, 0 }
   0xe   : > { %s8058_s23 = scalar_select %p5916_p9, 1, 0 }
   0xf   : > { %p5677_p10 = pneg %p5916_p9  ;;  %p5686_p11 = scmp.lt.s32.totalorder %s5838_s15, 2 }
  0x10   : > { %s143_s26 = sand.u32 1, %s5834_s14   ;;  %s5668_s30 = smul.u32 768, %s5838_s15 }
  0x11   : > { %p5926_p12 = pnand %p5677_p10, %p7989_p5  ;;  %p5932_p13 = pnand %p5686_p11, %p5903_p4 }
  0x12   : > { %s5667_s29 = smul.u32 48, %s143_s26  ;;  %s5757_s4 = scalar_lea.vmem %s130_s25, 32 }
  0x13   : > { %p5748_p0 = pneg %p5926_p12  ;;  %p5758_p1 = scmp.ne.s32.totalorder %s130_s25, %s5757_s4 }
  0x14   : > { %p5765_p6 = scmp.lt.s32.totalorder %s130_s25, %s130_s25  ;;  %p5766_p7 = scmp.lt.s32.totalorder %s5757_s4, %s5757_s4 }
  0x15   : > { %p5760_p2 = pnand %p5758_p1, %p5748_p0 }
  0x16   : > { %p5767_p10 = por %p5766_p7, %p5765_p6 }
  0x17   : > { %p5761_p3 = pneg %p5760_p2 }
  0x19   : > { %p5768_p5 = pnand %p5767_p10, %p5761_p3 }
  0x1b   : > { %5771 = shalt.err (!%p5768_p5)
}
  0x1c   : > { %5680 = dma.hbm_to_vmem [thread:$0]  (!%p5926_p12), %s7986_s1, 32, %s130_s25, [#allocation5]  }
  0x1d   : > { %s5947_s9 = scalar_lea.hbm %s7985_s0, %s5668_s30  ;;  %s147_s10 = scalar_lea.vmem [#allocation2], %s5667_s29 }
  0x1e   : > { %s154_s11 = sshll.u32 %s147_s10, 4  ;;  %s5951_s12 = scalar_lea.sflag [#allocation3], %s143_s26  ;;  %s5949_s11 = int_to_ptr.vmem [resolvable:$true] %s154_s11 }
  0x1f   : > { %s5772_s15 = scalar_lea.hbm %s5947_s9, 768  ;;  %p5774_p5 = pneg %p5932_p13 }
  0x20   : > { %p5773_p4 = scmp.ne.s32.totalorder %s5947_s9, %s5772_s15  ;;  %s5777_s21 = scalar_lea.hbm %s7985_s0, 1536 }
  0x21   : > { %p5778_p0 = scmp.lt.s32.totalorder %s5947_s9, %s7985_s0  ;;  %p5779_p1 = scmp.lt.s32.totalorder %s5777_s21, %s5772_s15 }
  0x22   : > { %p5775_p11 = pnand %p5774_p5, %p5773_p4 }
  0x23   : > { %p5780_p2 = por %p5779_p1, %p5778_p0 }
  0x24   : > { %p5776_p12 = pneg %p5775_p11 }
  0x26   : > { %p5781_p3 = pnand %p5780_p2, %p5776_p12 }
  0x28   : > { %5784 = shalt.err (!%p5781_p3)
}
  0x29   : > { %s5785_s26 = scalar_lea.vmem %s5949_s11, 768  ;;  %s5841_s27 = smov [#allocation2]  }
  0x2a   : > { %p5786_p6 = scmp.ne.s32.totalorder %s5949_s11, %s5785_s26  ;;  %s5790_s29 = sshll.u32 %s5841_s27, 4  ;;  %s5791_s29 = int_to_ptr.vmem [resolvable:$false] %s5790_s29 }
  0x2b   : > { %s5792_s30 = scalar_lea.vmem %s5791_s29, 1536  ;;  %p5793_p4 = scmp.lt.s32.totalorder %s5949_s11, %s5791_s29 }
  0x2c   : > { %p5788_p7 = pnand %p5786_p6, %p5774_p5  ;;  %p5794_p11 = scmp.lt.s32.totalorder %s5792_s30, %s5785_s26 }
  0x2e   : > { %p5789_p10 = pneg %p5788_p7  ;;  %p5795_p8 = por %p5794_p11, %p5793_p4 }
  0x30   : > { %p5796_p9 = pnand %p5795_p8, %p5789_p10 }
  0x32   : > { %5799 = shalt.err (!%p5796_p9)
}
  0x33   : > { %s5842_s4 = smov 128   ;;  %s5843_s5 = smov 8  }
  0x34   : > { %5684 = dma.hbm_to_vmem [thread:$0]  (!%p5932_p13), %s5947_s9, 768, %s5949_s11, %s5951_s12, %s5842_s4, %s5842_s4, %s5843_s5  }
  0x35   : > { %p8061_p5 = scmp.ne.s32.totalorder %s8058_s23, 0 }
  0x37   : > { %166 = sbr.rel (%p8061_p5) target bundleno = 828 (0x33c), region = 32 }
  0x3c   : > { %s168_s6 = sand.u32 1, %s5830_s13   ;;  %p8062_p8 = scmp.ne.s32.totalorder %s8057_s22, 0 }
  0x3d   : > { %s5669_s7 = smul.u32 48, %s168_s6  ;;  %s169_s8 = scalar_lea.sflag [#allocation3], %s168_s6 }
  0x3f   : > { %s5975_s10 = scalar_lea.vmem [#allocation2], %s5669_s7 }
  0x40   : > { %5817 = dma.done.wait (%p8062_p8), %s169_s8, 768  }
  0x41   : > { %5819 = vsyncadd (%p8062_p8), %s169_s8, 4294966528  ;;  %p8063_p9 = scmp.eq.s32.totalorder %s5888_s16, 0 }
  0x43   : > { %5821 = dma.done.wait (%p8063_p9), [#allocation5], 32   ;;  %p8064_p13 = pmov %p8063_p9 }
  0x44   : > { %v5986_v0 = vld [vmem:[%s5975_s10 + $0x8] sm:$0xff]  ;;  %v5989_v1 = vld [vmem:[%s5975_s10] sm:$0xff]  ;;  %s5844_s23 = smov 126   ;;  %s5845_s22 = smov 127   ;;  %v6009_v7 = vld [vmem:[%s5975_s10 + $0x18] sm:$0xff]  ;;  %vm252_vm0 = vcmask 1046528  }
  0x45   : > { %5823 = vsyncadd (%p8064_p13), [#allocation5], 4294967264  ;;  %218 = vrot.lane.b32.xlu0 %v5986_v0, %s5844_s23  ;;  %216 = vrot.lane.b32.xlu1 %v5989_v1, %s5844_s23  ;;  %v241_v2 = vmul.f32 2.0, %v5986_v0  ;;  %v5997_v3 = vld [vmem:[%s5975_s10 + $0x28] sm:$0xff]  ;;  %v240_v5 = vmul.f32 2.0, %v5989_v1  ;;  %v6015_v9 = vrot.slane %v5986_v0, 2 }
  0x46   : > { %v245_v11 = vmul.f32 2.0, %v5997_v3  ;;  %v243_v12 = vmul.f32 2.0, %v6009_v7  ;;  %vm298_vm1 = vcmask 1045504   ;;  %v6030_v14 = vld [vmem:[%s5975_s10 + $0x10] sm:$0xff]  ;;  %v6039_v17 = vld [vmem:[%s5975_s10 + $0x20] sm:$0xff]  ;;  %v299_v18 = vrot.slane %v5989_v1, 2 }
  0x47   : > { %v6002_v4 = vrot.slane %v241_v2, 1  ;;  %v381_v6 = vrot.slane %v241_v2, 2  ;;  %v253_v8 = vrot.slane %v240_v5, 1  ;;  %v380_v13 = vrot.slane %v240_v5, 2  ;;  %p199_p12 = scmp.lt.s32.totalorder %s5888_s16, 1 }
  0x48   : > { %v6036_v16 = vrot.slane %v243_v12, 1  ;;  %v6046_v19 = vrot.slane %v245_v11, 1  ;;  %v6050_v20 = vsel %vm298_vm1, %v299_v18, %v6015_v9  ;;  %v8013_v21 = vmov 0.0  }
  0x49   : > { %346 = vrot.lane.b32.xlu0 %v241_v2, %s5845_s22  ;;  %226 = vrot.lane.b32.xlu1 %v5997_v3, %s5844_s23  ;;  %v6019_v10 = vsel %vm252_vm0, %v253_v8, %v6002_v4  ;;  %v382_v15 = vsel %vm298_vm1, %v380_v13, %v381_v6  ;;  %v244_v22 = vmul.f32 2.0, %v6039_v17  ;;  %v242_v23 = vmul.f32 2.0, %v6030_v14  ;;  %s8468_s16 = smov (!%p199_p12, %s5888_s16), 1 }
  0x4a   : > { %5343 = vmatprep.subr.mxu0 %v8013_v21  ;;  %5350 = vmatprep.subr.mxu1 %v8013_v21  ;;  %v387_v24 = vrot.slane %v245_v11, 2  ;;  %v384_v25 = vrot.slane %v243_v12, 2  ;;  %v6077_v30 = vrot.slane %v5997_v3, 2  ;;  %v6080_v31 = vrot.slane %v6009_v7, 2  ;;  %s5670_s11 = smul.u32 54, %s8468_s16 }
  0x4b   : > { %v259_v26 = vrot.slane %v244_v22, 1  ;;  %v256_v27 = vrot.slane %v242_v23, 1  ;;  %v386_v32 = vrot.slane %v244_v22, 2  ;;  %v383_v33 = vrot.slane %v242_v23, 2 }
  0x4c   : > { %v305_v36 = vrot.slane %v6039_v17, 2  ;;  %v302_v37 = vrot.slane %v6030_v14, 2  ;;  %vm7992_vm2 = vmmov 0   ;;  %vm7998_vm7 = vmmov 1   ;;  %s7891_s18 = scalar_lea.vmem %s7988_s3, %s5670_s11 }
  0x4d   : > { %276 = vrot.lane.b32.xlu1 %v6002_v4, %s5844_s23  ;;  %344 = vrot.lane.b32.xlu0 %v240_v5, %s5845_s22  ;;  %v6066_v28 = vsel %vm252_vm0, %v259_v26, %v6046_v19  ;;  %v6070_v29 = vsel %vm252_vm0, %v256_v27, %v6036_v16  ;;  %v388_v34 = vsel %vm298_vm1, %v386_v32, %v387_v24 }
  0x4e   : > { %v385_v35 = vsel %vm298_vm1, %v383_v33, %v384_v25  ;;  %v6094_v38 = vsel %vm298_vm1, %v305_v36, %v6077_v30  ;;  %v6098_v39 = vsel %vm298_vm1, %v302_v37, %v6080_v31  ;;  %5347 = vmatprep.mubr.msk.f32.mxu0 %vm7992_vm2, %v8013_v21  ;;  %5354 = vmatprep.mubr.msk.f32.mxu1 %vm7992_vm2, %v8013_v21 }
  0x51   : > { %391 = vrot.lane.b32.xlu1 %v381_v6, %s5845_s22  ;;  %222 = vrot.lane.b32.xlu0 %v6009_v7, %s5844_s23 }
  0x55   : > { %322 = vrot.lane.b32.xlu1 %v6015_v9, %s5844_s23  ;;  %274 = vrot.lane.b32.xlu0 %v6019_v10, %s5844_s23 }
  0x59   : > { %354 = vrot.lane.b32.xlu1 %v245_v11, %s5845_s22  ;;  %350 = vrot.lane.b32.xlu0 %v243_v12, %s5845_s22 }
  0x5d   : > { %220 = vrot.lane.b32.xlu1 %v6030_v14, %s5844_s23  ;;  %389 = vrot.lane.b32.xlu0 %v382_v15, %s5845_s22 }
  0x61   : > { %280 = vrot.lane.b32.xlu1 %v6036_v16, %s5844_s23  ;;  %224 = vrot.lane.b32.xlu0 %v6039_v17, %s5844_s23 }
  0x65   : > { %320 = vrot.lane.b32.xlu1 %v6050_v20, %s5844_s23  ;;  %284 = vrot.lane.b32.xlu0 %v6046_v19, %s5844_s23 }
  0x69   : > { %352 = vrot.lane.b32.xlu1 %v244_v22, %s5845_s22  ;;  %348 = vrot.lane.b32.xlu0 %v242_v23, %s5845_s22 }
  0x6d   : > { %399 = vrot.lane.b32.xlu1 %v387_v24, %s5845_s22  ;;  %395 = vrot.lane.b32.xlu0 %v384_v25, %s5845_s22 }
  0x71   : > { %282 = vrot.lane.b32.xlu1 %v6066_v28, %s5844_s23  ;;  %278 = vrot.lane.b32.xlu0 %v6070_v29, %s5844_s23 }
  0x75   : > { %330 = vrot.lane.b32.xlu1 %v6077_v30, %s5844_s23  ;;  %326 = vrot.lane.b32.xlu0 %v6080_v31, %s5844_s23 }
  0x79   : > { %397 = vrot.lane.b32.xlu1 %v388_v34, %s5845_s22  ;;  %393 = vrot.lane.b32.xlu0 %v385_v35, %s5845_s22 }
  0x7d   : > { %328 = vrot.lane.b32.xlu1 %v6094_v38, %s5844_s23  ;;  %324 = vrot.lane.b32.xlu0 %v6098_v39, %s5844_s23 }
  0xb7   : > { %v219_v40 = vpop.permute.xlu0 %218  ;;  %v217_v41 = vpop.permute.xlu1 %216 }
  0xb8   : > { %v235_v44 = vsub.f32 %v5986_v0, %v219_v40 }
  0xba   : > { %v269_v49 = vadd.f32 %v6002_v4, %v235_v44  ;;  %v234_v4 = vsub.f32 %v5989_v1, %v217_v41 }
  0xbb   : > { %v347_v42 = vpop.permute.xlu0 %346  ;;  %v6108_v43 = vpop.permute.xlu1 %226 }
  0xbc   : > { %v363_v45 = vadd.f32 %v347_v42, %v5986_v0  ;;  %v268_v22 = vadd.f32 %v6019_v10, %v234_v4  ;;  %v8065_v42 = vmov 0 }
  0xbe   : > { %v369_v48 = vadd.f32 %v363_v45, %v219_v40 }
  0xbf   : > { %v277_v46 = vpop.permute.xlu1 %276  ;;  %v345_v47 = vpop.permute.xlu0 %344 }
  0xc0   : > { %v293_v50 = vsub.f32 %v269_v49, %v277_v46  ;;  %v375_v53 = vsub.f32 %v369_v48, %v6015_v9  ;;  %v362_v5 = vadd.f32 %v345_v47, %v5989_v1 }
  0xc2   : > { %v315_v54 = vadd.f32 %v6015_v9, %v293_v50  ;;  %v368_v18 = vadd.f32 %v362_v5, %v217_v41 }
  0xc3   : > { %v392_v51 = vpop.permute.xlu1 %391  ;;  %v6113_v52 = vpop.permute.xlu0 %222 }
  0xc4   : > { %v408_v55 = vsub.f32 %v375_v53, %v392_v51  ;;  %v374_v37 = vsub.f32 %v368_v18, %v6050_v20 }
  0xc7   : > { %v323_v56 = vpop.permute.xlu1 %322  ;;  %v275_v57 = vpop.permute.xlu0 %274 }
  0xc8   : > { %v339_v58 = vsub.f32 %v315_v54, %v323_v56  ;;  %v414_v59 = vsub.f32 %v408_v55, %v323_v56  ;;  %v292_v25 = vsub.f32 %v268_v22, %v275_v57  ;;  %v239_v54 = vsub.f32 %v5997_v3, %v6108_v43 }
  0xc9   : > { %v237_v56 = vsub.f32 %v6009_v7, %v6113_v52 }
  0xca   : > { %v420_v60 = vmul.f32 %v339_v58, %v339_v58  ;;  %v426_v61 = vmul.f32 %v414_v59, %v414_v59  ;;  %vm480_vm3 = vcmp.lt.f32.partialorder %v339_v58, 0.0  ;;  %v6117_v62 = vand.u32 2147483647, %v339_v58 }
  0xcb   : > { %v492_v63 = vsub.f32 0.0, %v414_v59  ;;  %v355_v0 = vpop.permute.xlu1 %354  ;;  %v351_v2 = vpop.permute.xlu0 %350  ;;  %v314_v40 = vadd.f32 %v6050_v20, %v292_v25  ;;  %v8069_v20 = vmov 0 }
  0xcc   : > { %v6121_v6 = vadd.f32 %v426_v61, %v420_v60  ;;  %v660_v9 = vmul.f32 -0.9396926, %v6117_v62  ;;  %v510_v15 = vmul.f32 0.9396926, %v6117_v62  ;;  %v582_v24 = vmul.f32 0.17364818, %v6117_v62 }
  0xcd   : > { %v498_v8 = vsel %vm480_vm3, %v492_v63, %v414_v59  ;;  %v558_v34 = vmul.f32 0.5, %v6117_v62  ;;  %v606_v36 = vmul.f32 -0.17364818, %v6117_v62  ;;  %vm504_vm4 = vcmp.eq.f32.partialorder %v6117_v62, 0.0 }
  0xce   : > { %5728 = vrsqrt.f32 %v6121_v6  ;;  %v588_v11 = vmul.f32 0.9848077, %v498_v8  ;;  %v516_v23 = vmul.f32 0.34202015, %v498_v8  ;;  %v564_v1 = vmul.f32 0.8660254, %v498_v8  ;;  %vm6155_vm8 = vmxor %vm504_vm4, %vm7998_vm7 }
  0xcf   : > { %v6125_v12 = vpop.permute.xlu1 %220  ;;  %v390_v13 = vpop.permute.xlu0 %389  ;;  %v624_v44 = vmul.f32 -0.5, %v6117_v62  ;;  %v6150_v51 = vmul.f32 0.64278764, %v498_v8  ;;  %v8070_v20 = vsel %vm6155_vm8, 4294967295, %v8069_v20  ;;  %v642_v53 = vmul.f32 -0.76604444, %v6117_v62 }
  0xd0   : > { %v666_v26 = vsub.f32 %v660_v9, %v516_v23  ;;  %v522_v33 = vsub.f32 %v510_v15, %v516_v23  ;;  %v594_v35 = vsub.f32 %v582_v24, %v588_v11  ;;  %v612_v10 = vsub.f32 %v606_v36, %v588_v11 }
  0xd1   : > { %v407_v41 = vsub.f32 %v374_v37, %v390_v13  ;;  %v570_v48 = vsub.f32 %v558_v34, %v564_v1  ;;  %v630_v59 = vsub.f32 %v624_v44, %v564_v1  ;;  %v367_v61 = vadd.f32 %v355_v0, %v5997_v3 }
  0xd2   : > { %vm6139_vm5 = vcmp.ge.f32.partialorder %v666_v26, 0.0  ;;  %vm6146_vm6 = vcmp.ge.f32.partialorder %v522_v33, 0.0  ;;  %vm6166_vm10 = vcmp.ge.f32.partialorder %v594_v35, 0.0  ;;  %v365_v63 = vadd.f32 %v351_v2, %v6009_v7 }
  0xd3   : > { %v6130_v27 = vpop.permute.xlu1 %280  ;;  %v6132_v32 = vpop.permute.xlu0 %224  ;;  %v8066_v42 = vsel %vm6139_vm5, 4294967295, %v8065_v42  ;;  %vm678_vm11 = vmxor %vm6146_vm6, %vm7998_vm7  ;;  %vm6177_vm12 = vcmp.ge.f32.partialorder %v570_v48, 0.0  ;;  %vm6191_vm14 = vcmp.ge.f32.partialorder %v612_v10, 0.0  ;;  %v648_v7 = vsub.f32 %v642_v53, %v6150_v51 }
  0xd4   : > { %vm6187_vm13 = vmxor %vm6166_vm10, %vm7998_vm7  ;;  %v271_v2 = vadd.f32 %v6036_v16, %v237_v56  ;;  %v273_v15 = vadd.f32 %v6046_v19, %v239_v54  ;;  %vm6209_vm3 = vcmp.ge.f32.partialorder %v630_v59, 0.0  ;;  %v449_v22 = vand.u32 2147483648, %v6121_v6 }
  0xd5   : > { %vm6198_vm15 = vmor %vm678_vm11, %vm504_vm4  ;;  %vm446_vm4 = vcmp.eq.f32.partialorder %v6121_v6, inf  ;;  %v373_v23 = vadd.f32 %v367_v61, %v6108_v43  ;;  %v371_v16 = vadd.f32 %v365_v63, %v6113_v52  ;;  %vm448_vm9 = vcmp.eq.f32.partialorder %v6121_v6, 0.0 }
  0xd6   : > { %vm6220_vm11 = vmxor %vm6191_vm14, %vm7998_vm7  ;;  %vm6230_vm1 = vcmp.ge.f32.partialorder %v648_v7, 0.0  ;;  %v8085_v43 = vmov 0  ;;  %v295_v52 = vsub.f32 %v271_v2, %v6130_v27  ;;  %v236_v27 = vsub.f32 %v6030_v14, %v6125_v12 }
  0xd7   : > { %v321_v45 = vpop.permute.xlu1 %320  ;;  %v6144_v46 = vpop.permute.xlu0 %284  ;;  %v8086_v43 = vsel %vm6230_vm1, 4294967295, %v8085_v43  ;;  %vm6268_vm2 = vmxor %vm6230_vm1, %vm7998_vm7  ;;  %vm8116_vm1 = vmmov 1  }
  0xd8   : > { %v338_v49 = vsub.f32 %v314_v40, %v321_v45  ;;  %v413_v50 = vsub.f32 %v407_v41, %v321_v45  ;;  %v297_v33 = vsub.f32 %v273_v15, %v6144_v46  ;;  %v379_v45 = vsub.f32 %v373_v23, %v6077_v30 }
  0xd9   : > { %v377_v46 = vsub.f32 %v371_v16, %v6080_v31  ;;  %v270_v7 = vadd.f32 %v6070_v29, %v236_v27 }
  0xda   : > { %v419_v57 = vmul.f32 %v338_v49, %v338_v49  ;;  %v425_v58 = vmul.f32 %v413_v50, %v413_v50  ;;  %v491_v25 = vsub.f32 0.0, %v413_v50  ;;  %vm479_vm0 = vcmp.lt.f32.partialorder %v338_v49, 0.0 }
  0xdb   : > { %v5729_v60 = vpop.eup %5728  ;;  %v353_v4 = vpop.permute.xlu1 %352  ;;  %v6254_v36 = vand.u32 2147483647, %v338_v49  ;;  %v317_v49 = vadd.f32 %v6080_v31, %v295_v52  ;;  %v319_v53 = vadd.f32 %v6077_v30, %v297_v33 }
  0xdc   : > { %v349_v5 = vpop.permute.xlu0 %348  ;;  %v445_v9 = vmul.f32 %v5729_v60, %v6121_v6  ;;  %v6182_v11 = vadd.f32 %v425_v58, %v419_v57  ;;  %v6272_v44 = vsel %vm479_vm0, %v491_v25, %v413_v50  ;;  %v238_v50 = vsub.f32 %v6039_v17, %v6132_v32  ;;  %vm756_vm0 = vmand %vm6209_vm3, %vm6268_vm2 }
  0xdd   : > { %v366_v54 = vadd.f32 %v353_v4, %v6039_v17  ;;  %v364_v56 = vadd.f32 %v349_v5, %v6030_v14  ;;  %v509_v17 = vmul.f32 0.9396926, %v6254_v36  ;;  %v6305_v14 = vmul.f32 0.34202015, %v6272_v44 }
  0xde   : > { %5730 = vrsqrt.f32 %v6182_v11  ;;  %v447_v26 = vsel %vm446_vm4, %v6121_v6, %v445_v9  ;;  %vm6241_vm4 = vmxor %vm6209_vm3, %vm7998_vm7  ;;  %v534_v9 = vmul.f32 0.76604444, %v6117_v62  ;;  %v272_v13 = vadd.f32 %v6066_v28, %v238_v50 }
  0xdf   : > { %v400_v24 = vpop.permute.xlu1 %399  ;;  %v6236_v34 = vsel %vm448_vm9, %v449_v22, %v447_v26  ;;  %vm8089_vm9 = vcmask 113664   ;;  %v372_v5 = vadd.f32 %v366_v54, %v6132_v32  ;;  %v370_v3 = vadd.f32 %v364_v56, %v6125_v12  ;;  %vm6347_vm3 = vmxor %vm6139_vm5, %vm7998_vm7 }
  0xe0   : > { %v396_v1 = vpop.permute.xlu0 %395  ;;  %v786_v35 = vsel %vm6198_vm15, %v6236_v34, 0.0  ;;  %vm8090_vm15 = vmand %vm6177_vm12, %vm6187_vm13  ;;  %v412_v57 = vsub.f32 %v379_v45, %v400_v24  ;;  %v6308_v59 = vsel %vm756_vm0, %v6236_v34, 0.0  ;;  %v521_v28 = vsub.f32 %v509_v17, %v6305_v14 }
  0xe1   : > { %5344 = vmatpush3.xpose.msk.msra.mxu0 %vm8089_vm9, %v786_v35  ;;  %v6263_v40 = vsel %vm8090_vm15, %v6236_v34, 0.0  ;;  %vm8093_vm13 = vmand %vm6166_vm10, %vm6220_vm11  ;;  %v410_v58 = vsub.f32 %v377_v46, %v396_v1  ;;  %8096 = vst [vmem:[#allocation9_spill] sm:$0xff] %v6308_v59  ;;  %v546_v29 = vsub.f32 %v534_v9, %v6150_v51  ;;  %v378_v1 = vsub.f32 %v372_v5, %v6094_v38 }
  0xe2   : > { %5345 = vmatprep.subr.mxu0 %v8013_v21  ;;  %v6283_v48 = vsel %vm8093_vm13, %v6236_v34, 0.0  ;;  %vm8094_vm10 = vmand %vm6191_vm14, %vm6241_vm4  ;;  %v376_v25 = vsub.f32 %v370_v3, %v6098_v39  ;;  %vm7994_vm2 = vcmp.eq.f32.partialorder %v6254_v36, 0.0  ;;  %vm6340_vm14 = vcmp.ge.f32.partialorder %v521_v28, 0.0 }
  0xe3   : > { %v283_v37 = vpop.permute.xlu1 %282  ;;  %v6297_v55 = vsel %vm8094_vm10, %v6236_v34, 0.0  ;;  %v8097_v51 = vmov 0  ;;  %v8099_v35 = vmov 0  ;;  %vm439_vm11 = vcmp.eq.f32.partialorder %v6182_v11, inf  ;;  %vm677_vm9 = vmxor %vm6340_vm14, %vm7998_vm7 }
  0xe4   : > { %v279_v10 = vpop.permute.xlu0 %278  ;;  %8095 = vst [vmem:[#allocation8_spill] sm:$0xff] %v6297_v55  ;;  %v296_v18 = vsub.f32 %v272_v13, %v283_v37  ;;  %v8098_v51 = vsel %vm6340_vm14, 4294967295, %v8097_v51  ;;  %v8100_v35 = vsel %vm6347_vm3, 4294967295, %v8099_v35  ;;  %v6362_v41 = vmul.f32 0.64278764, %v6272_v44  ;;  %vm683_vm0 = vmor %vm677_vm9, %vm7994_vm2 }
  0xe5   : > { %v294_v16 = vsub.f32 %v270_v7, %v279_v10  ;;  %v6354_v10 = vmul.f32 0.76604444, %v6254_v36  ;;  %vm441_vm10 = vcmp.eq.f32.partialorder %v6182_v11, 0.0  ;;  %v6391_v7 = vmul.f32 0.8660254, %v6272_v44 }
  0xe6   : > { %v318_v33 = vadd.f32 %v6094_v38, %v296_v18  ;;  %v442_v38 = vand.u32 2147483648, %v6182_v11  ;;  %vm8103_vm9 = vcmask 113664   ;;  %vm8104_vm4 = vmmov 0  }
  0xe7   : > { %v331_v30 = vpop.permute.xlu1 %330  ;;  %v316_v37 = vadd.f32 %v6098_v39, %v294_v16  ;;  %v8174_v55 = vmov 0.0   ;;  %v8238_v59 = vmov 0 }
  0xe8   : > { %v327_v31 = vpop.permute.xlu0 %326  ;;  %v6310_v60 = vsub.f32 %v319_v53, %v331_v30  ;;  %v418_v61 = vsub.f32 %v412_v57, %v331_v30 }
  0xe9   : > { %v6312_v63 = vsub.f32 %v317_v49, %v327_v31  ;;  %v6314_v4 = vsub.f32 %v410_v58, %v327_v31 }
  0xea   : > { %v424_v0 = vmul.f32 %v6310_v60, %v6310_v60  ;;  %v430_v2 = vmul.f32 %v418_v61, %v418_v61  ;;  %v496_v49 = vsub.f32 0.0, %v418_v61  ;;  %vm484_vm15 = vcmp.lt.f32.partialorder %v6310_v60, 0.0 }
  0xeb   : > { %v5731_v15 = vpop.eup %5730  ;;  %v422_v22 = vmul.f32 %v6312_v63, %v6312_v63  ;;  %v428_v32 = vmul.f32 %v6314_v4, %v6314_v4  ;;  %v398_v23 = vpop.permute.xlu1 %397  ;;  %v494_v54 = vsub.f32 0.0, %v6314_v4  ;;  %vm482_vm13 = vcmp.lt.f32.partialorder %v6312_v63, 0.0 }
  0xec   : > { %v394_v62 = vpop.permute.xlu0 %393  ;;  %v6328_v12 = vadd.f32 %v430_v2, %v424_v0  ;;  %v438_v19 = vmul.f32 %v5731_v15, %v6182_v11  ;;  %v411_v26 = vsub.f32 %v378_v1, %v398_v23  ;;  %v6382_v9 = vsel %vm484_vm15, %v496_v49, %v418_v61  ;;  %v6401_v61 = vld [vmem:[%s7987_s2] sm:$0x3] }
  0xed   : > { %v6331_v24 = vadd.f32 %v428_v32, %v422_v22  ;;  %v409_v27 = vsub.f32 %v376_v25, %v394_v62  ;;  %v6385_v13 = vand.u32 2147483647, %v6312_v63  ;;  %v6394_v0 = vsel %vm482_vm13, %v494_v54, %v6314_v4 }
  0xee   : > { %5732 = vrsqrt.f32 %v6328_v12  ;;  %v440_v39 = vsel %vm439_vm11, %v6182_v11, %v438_v19  ;;  %vm6378_vm11 = vcmp.ge.f32.partialorder %v546_v29, 0.0  ;;  %v545_v63 = vsub.f32 %v6354_v10, %v6362_v41 }
  0xef   : > { %5734 = vrsqrt.f32 %v6331_v24  ;;  %v329_v52 = vpop.permute.xlu1 %328  ;;  %v6374_v17 = vsel %vm441_vm10, %v442_v38, %v440_v39  ;;  %v6408_v4 = vmul.f32 0.5, %v6254_v36  ;;  %vm474_vm13 = vcmp.eq.f32.partialorder %v6328_v12, inf  ;;  %vm6479_vm5 = vmxor %vm6378_vm11, %vm7998_vm7 }
  0xf0   : > { %v325_v6 = vpop.permute.xlu0 %324  ;;  %v342_v45 = vsub.f32 %v318_v33, %v329_v52  ;;  %v417_v46 = vsub.f32 %v411_v26, %v329_v52  ;;  %v785_v11 = vsel %vm683_vm0, %v6374_v17, 0.0  ;;  %v6412_v15 = vand.u32 2147483647, %v6310_v60 }
  0xf1   : > { %v340_v50 = vsub.f32 %v316_v37, %v325_v6  ;;  %v415_v53 = vsub.f32 %v409_v27, %v325_v6  ;;  %5346 = vmatpush3.xpose.msk.msra.mxu0 %vm8103_vm9, %v785_v11  ;;  %v6415_v18 = vmul.f32 0.34202015, %v6382_v9  ;;  %vm460_vm10 = vcmp.eq.f32.partialorder %v6331_v24, inf }
  0xf2   : > { %v423_v56 = vmul.f32 %v342_v45, %v342_v45  ;;  %v429_v57 = vmul.f32 %v417_v46, %v417_v46  ;;  %v495_v2 = vsub.f32 0.0, %v417_v46  ;;  %vm483_vm15 = vcmp.lt.f32.partialorder %v342_v45, 0.0  ;;  %5357 = vmatprep.subr.mxu0 %v8013_v21 }
  0xf3   : > { %v421_v58 = vmul.f32 %v340_v50, %v340_v50  ;;  %v427_v30 = vmul.f32 %v415_v53, %v415_v53  ;;  %v493_v22 = vsub.f32 0.0, %v415_v53  ;;  %vm481_vm0 = vcmp.lt.f32.partialorder %v340_v50, 0.0 }
  0xf4   : > { %v6372_v31 = vadd.f32 %v429_v57, %v423_v56  ;;  %5348 = vmatmul.mubr.msk.f32.vlgmr.msra.gmra.mxu0 %vm8103_vm9, %v6401_v61  ;;  %v512_v32 = vmul.f32 0.9396926, %v6385_v13  ;;  %v518_v23 = vmul.f32 0.34202015, %v6394_v0  ;;  %v463_v28 = vand.u32 2147483648, %v6331_v24 }
  0xf5   : > { %v6387_v3 = vadd.f32 %v427_v30, %v421_v58  ;;  %v6424_v60 = vsel %vm483_vm15, %v495_v2, %v417_v46  ;;  %v6426_v16 = vand.u32 2147483647, %v340_v50  ;;  %vm462_vm2 = vcmp.eq.f32.partialorder %v6331_v24, 0.0  ;;  %5361 = vmatprep.mubr.msk.f32.mxu0 %vm8104_vm4, %v8013_v21 }
  0xf6   : > { %5736 = vrsqrt.f32 %v6372_v31  ;;  %v6432_v19 = vand.u32 2147483647, %v342_v45  ;;  %v524_v25 = vsub.f32 %v512_v32, %v518_v23  ;;  %v662_v26 = vmul.f32 -0.9396926, %v6385_v13 }
  0xf7   : > { %5738 = vrsqrt.f32 %v6387_v3  ;;  %v6437_v33 = vsel %vm481_vm0, %v493_v22, %v415_v53  ;;  %vm506_vm15 = vcmp.eq.f32.partialorder %v6385_v13, 0.0  ;;  %v514_v6 = vmul.f32 0.9396926, %v6412_v15 }
  0xf8   : > { %v6442_v27 = vmul.f32 0.34202015, %v6424_v60  ;;  %vm6444_vm9 = vcmp.ge.f32.partialorder %v524_v25, 0.0  ;;  %v536_v38 = vmul.f32 0.76604444, %v6385_v13  ;;  %v668_v45 = vsub.f32 %v662_v26, %v518_v23 }
  0xf9   : > { %v6453_v49 = vmul.f32 0.64278764, %v6394_v0  ;;  %vm680_vm0 = vmxor %vm6444_vm9, %vm7998_vm7  ;;  %v526_v50 = vsub.f32 %v514_v6, %v6415_v18  ;;  %v511_v53 = vmul.f32 0.9396926, %v6426_v16  ;;  %v8107_v56 = vmov 0 }
  0xfa   : > { %vm686_vm8 = vmor %vm680_vm0, %vm506_vm15  ;;  %v6474_v57 = vmul.f32 0.34202015, %v6437_v33  ;;  %v8111_v11 = vmov 0  ;;  %v513_v2 = vmul.f32 0.9396926, %v6432_v19  ;;  %v8113_v23 = vmov 0 }
  0xfb   : > { %v5733_v62 = vpop.eup %5732  ;;  %v6492_v22 = vmul.f32 0.64278764, %v6382_v9  ;;  %v6495_v32 = vmul.f32 0.64278764, %v6437_v33  ;;  %vm6500_vm0 = vmxor %vm506_vm15, %vm7998_vm7  ;;  %vm8005_vm7 = vcmp.eq.f32.partialorder %v6412_v15, 0.0  ;;  %v8212_v10 = vmov 0 }
  0xfc   : > { %v5735_v29 = vpop.eup %5734  ;;  %v473_v1 = vmul.f32 %v5733_v62, %v6328_v12  ;;  %v8114_v23 = vsel %vm6500_vm0, 4294967295, %v8113_v23  ;;  %v523_v62 = vsub.f32 %v511_v53, %v6474_v57  ;;  %v6625_v8 = vmul.f32 0.8660254, %v6394_v0 }
  0xfd   : > { %v459_v52 = vmul.f32 %v5735_v29, %v6331_v24  ;;  %v525_v29 = vsub.f32 %v513_v2, %v6442_v27  ;;  %v581_v58 = vmul.f32 0.17364818, %v6254_v36 }
  0xfe   : > { %v475_v39 = vsel %vm474_vm13, %v6328_v12, %v473_v1  ;;  %vm476_vm13 = vcmp.eq.f32.partialorder %v6328_v12, 0.0  ;;  %v535_v1 = vmul.f32 0.76604444, %v6426_v16  ;;  %vm6522_vm3 = vcmp.ge.f32.partialorder %v523_v62, 0.0 }
  0xff   : > { %v461_v46 = vsel %vm460_vm10, %v6331_v24, %v459_v52  ;;  %vm6467_vm10 = vcmp.ge.f32.partialorder %v668_v45, 0.0  ;;  %v477_v24 = vand.u32 2147483648, %v6328_v12  ;;  %vm6535_vm0 = vcmp.ge.f32.partialorder %v525_v29, 0.0 }
 0x100   : > { %v6465_v54 = vsel %vm462_vm2, %v463_v28, %v461_v46  ;;  %v8108_v56 = vsel %vm6467_vm10, 4294967295, %v8107_v56  ;;  %vm6485_vm2 = vcmp.ge.f32.partialorder %v526_v50, 0.0  ;;  %v548_v28 = vsub.f32 %v536_v38, %v6453_v49  ;;  %vm679_vm10 = vmxor %vm6522_vm3, %vm8116_vm1 }
 0x101   : > { %v788_v30 = vsel %vm686_vm8, %v6465_v54, 0.0  ;;  %v8112_v11 = vsel %vm6485_vm2, 4294967295, %v8111_v11  ;;  %vm8115_vm8 = vcmask 113664   ;;  %v6511_v12 = vsel %vm476_vm13, %v477_v24, %v475_v39  ;;  %vm682_vm4 = vmxor %vm6485_vm2, %vm8116_vm1 }
 0x102   : > { %5351 = vmatpush3.xpose.msk.msra.mxu1 %vm8115_vm8, %v788_v30  ;;  %v470_v38 = vand.u32 2147483648, %v6372_v31  ;;  %vm453_vm8 = vcmp.eq.f32.partialorder %v6387_v3, inf  ;;  %vm688_vm15 = vmor %vm682_vm4, %vm8005_vm7  ;;  %v456_v50 = vand.u32 2147483648, %v6387_v3  ;;  %vm8007_vm13 = vcmp.eq.f32.partialorder %v6426_v16, 0.0 }
 0x103   : > { %5352 = vmatprep.subr.mxu1 %v8013_v21  ;;  %v5737_v25 = vpop.eup %5736  ;;  %v790_v53 = vsel %vm688_vm15, %v6511_v12, 0.0  ;;  %vm8121_vm2 = vcmp.eq.f32.partialorder %v6372_v31, inf  ;;  %vm6549_vm4 = vcmp.ge.f32.partialorder %v548_v28, 0.0  ;;  %v8122_v24 = vmov 0  ;;  %vm6556_vm14 = vmor %vm679_vm10, %vm8007_vm13 }
 0x104   : > { %v5739_v52 = vpop.eup %5738  ;;  %v466_v6 = vmul.f32 %v5737_v25, %v6372_v31  ;;  %v8123_v24 = vsel %vm6549_vm4, 4294967295, %v8122_v24  ;;  %vm8124_vm7 = vcmask 113664   ;;  %v547_v2 = vsub.f32 %v535_v1, %v6495_v32  ;;  %vm681_vm10 = vmxor %vm6535_vm0, %vm8116_vm1 }
 0x105   : > { %v452_v46 = vmul.f32 %v5739_v52, %v6387_v3  ;;  %5358 = vmatpush3.xpose.msk.msra.mxu0 %vm8124_vm7, %v790_v53  ;;  %v538_v62 = vmul.f32 0.76604444, %v6412_v15  ;;  %vm8127_vm15 = vcmp.eq.f32.partialorder %v6372_v31, 0.0  ;;  %vm8008_vm7 = vcmp.eq.f32.partialorder %v6432_v19, 0.0 }
 0x106   : > { %v468_v39 = vsel %vm8121_vm2, %v6372_v31, %v466_v6  ;;  %vm455_vm2 = vcmp.eq.f32.partialorder %v6387_v3, 0.0  ;;  %5359 = vmatprep.subr.mxu0 %v8013_v21  ;;  %v6574_v1 = vmul.f32 0.64278764, %v6424_v60  ;;  %vm6583_vm13 = vcmp.ge.f32.partialorder %v545_v63, 0.0 }
 0x107   : > { %v454_v29 = vsel %vm453_vm8, %v6387_v3, %v452_v46  ;;  %v6567_v28 = vsel %vm8127_vm15, %v470_v38, %v468_v39  ;;  %vm687_vm8 = vmor %vm681_vm10, %vm8008_vm7  ;;  %v537_v3 = vmul.f32 0.76604444, %v6432_v19  ;;  %vm6601_vm7 = vcmp.ge.f32.partialorder %v547_v2, 0.0 }
 0x108   : > { %v6576_v25 = vsel %vm455_vm2, %v456_v50, %v454_v29  ;;  %vm6591_vm15 = vmxor %vm6549_vm4, %vm8116_vm1  ;;  %v789_v38 = vsel %vm687_vm8, %v6567_v28, 0.0  ;;  %vm8132_vm2 = vcmask 113664   ;;  %v550_v63 = vsub.f32 %v538_v62, %v6492_v22 }
 0x109   : > { %v787_v6 = vsel %vm6556_vm14, %v6576_v25, 0.0  ;;  %vm8133_vm10 = vmmov %vm8132_vm2  ;;  %v569_v53 = vsub.f32 %v6408_v4, %v6391_v7  ;;  %v549_v39 = vsub.f32 %v537_v3, %v6574_v1  ;;  %v560_v30 = vmul.f32 0.5, %v6385_v13 }
 0x10a   : > { %5353 = vmatpush3.xpose.msk.msra.mxu1 %vm8132_vm2, %v787_v6  ;;  %5360 = vmatpush3.xpose.msk.msra.mxu0 %vm8133_vm10, %v789_v38  ;;  %vm6609_vm4 = vmxor %vm6177_vm12, %vm8116_vm1  ;;  %v6634_v2 = vmul.f32 0.8660254, %v6382_v9  ;;  %v562_v29 = vmul.f32 0.5, %v6412_v15  ;;  %v6656_v3 = vmul.f32 0.9848077, %v6272_v44  ;;  %v8149_v44 = vmov 0 }
 0x10b   : > { %5364 = vmatprep.subr.mxu1 %v8013_v21  ;;  %5371 = vmatprep.subr.mxu0 %v8013_v21  ;;  %vm6618_vm14 = vmxor %vm6583_vm13, %vm8116_vm1  ;;  %v6680_v52 = vmul.f32 0.8660254, %v6437_v33  ;;  %v572_v6 = vsub.f32 %v560_v30, %v6625_v8  ;;  %v6721_v62 = vmul.f32 0.9848077, %v6394_v0  ;;  %v583_v31 = vmul.f32 0.17364818, %v6426_v16 }
 0x10c   : > { %vm698_vm12 = vmand %vm6444_vm9, %vm6591_vm15  ;;  %v574_v50 = vsub.f32 %v562_v29, %v6634_v2  ;;  %v6848_v30 = vmul.f32 -0.9396926, %v6426_v16  ;;  %v6851_v45 = vmul.f32 -0.9396926, %v6412_v15 }
 0x10d   : > { %vm8140_vm8 = vmmov %vm8132_vm2  ;;  %5362 = vmatmul.mubr.msk.f32.vlgmr.msra.gmra.mxu0 %vm8132_vm2, %v6401_v61  ;;  %v794_v37 = vsel %vm698_vm12, %v6465_v54, 0.0  ;;  %vm8148_vm12 = vnez %v8098_v51  ;;  %v8152_v51 = vmov 0 }
 0x10e   : > { %5355 = vmatmul.mubr.msk.f32.vlgmr.msra.gmra.mxu1 %vm8140_vm8, %v6401_v61  ;;  %vm8141_vm10 = vmand %vm6146_vm6, %vm6479_vm5  ;;  %vm6660_vm5 = vcmp.ge.f32.partialorder %v550_v63, 0.0  ;;  %vm6690_vm6 = vcmp.ge.f32.partialorder %v549_v39, 0.0  ;;  %v6707_v39 = vmul.f32 0.8660254, %v6424_v60 }
 0x10f   : > { %v792_v4 = vsel %vm8141_vm10, %v6236_v34, 0.0  ;;  %vm6650_vm9 = vmxor %vm6601_vm7, %vm8116_vm1  ;;  %vm6675_vm10 = vcmp.ge.f32.partialorder %v569_v53, 0.0  ;;  %v8153_v51 = vsel %vm6690_vm6, 4294967295, %v8152_v51  ;;  %v559_v53 = vmul.f32 0.5, %v6426_v16 }
 0x110   : > { %vm8144_vm15 = vmmov %vm8132_vm2  ;;  %v8150_v44 = vsel %vm6675_vm10, 4294967295, %v8149_v44 }
 0x111   : > { %5365 = vmatpush3.xpose.msk.msra.mxu1 %vm8144_vm15, %v792_v4  ;;  %vm8145_vm8 = vmmov %vm8132_vm2  ;;  %v561_v4 = vmul.f32 0.5, %v6432_v19  ;;  %v571_v46 = vsub.f32 %v559_v53, %v6680_v52  ;;  %v605_v53 = vmul.f32 -0.17364818, %v6254_v36 }
 0x112   : > { %5372 = vmatpush3.xpose.msk.msra.mxu0 %vm8145_vm8, %v794_v37  ;;  %5366 = vmatprep.subr.mxu1 %v8013_v21  ;;  %vm695_vm2 = vmand %vm8148_vm12, %vm6618_vm14  ;;  %vm8151_vm8 = vmmov 0   ;;  %vm8156_vm14 = vcmask 113664   ;;  %v593_v37 = vsub.f32 %v581_v58, %v6656_v3  ;;  %v8164_v58 = vmov 0 }
 0x113   : > { %5373 = vmatprep.subr.mxu0 %v8013_v21  ;;  %vm697_vm15 = vmand %vm6522_vm3, %vm6650_vm9  ;;  %5368 = vmatprep.mubr.msk.f32.mxu1 %vm8151_vm8, %v8013_v21  ;;  %v791_v38 = vsel %vm695_vm2, %v6374_v17, 0.0  ;;  %v573_v26 = vsub.f32 %v561_v4, %v6707_v39  ;;  %v608_v4 = vmul.f32 -0.17364818, %v6385_v13 }
 0x114   : > { %5375 = vmatprep.mubr.msk.f32.mxu0 %vm8151_vm8, %v8013_v21  ;;  %v793_v63 = vsel %vm697_vm15, %v6576_v25, 0.0  ;;  %vm6700_vm3 = vmxor %vm6660_vm5, %vm8116_vm1  ;;  %vm8162_vm15 = vnez %v8112_v11  ;;  %v8168_v11 = vmov 0 }
 0x115   : > { %5367 = vmatpush3.xpose.msk.msra.mxu1 %vm8156_vm14, %v791_v38  ;;  %vm8157_vm9 = vmmov %vm8156_vm14  ;;  %v6733_v38 = vmul.f32 -0.9396926, %v6254_v36 }
 0x116   : > { %5374 = vmatpush3.xpose.msk.msra.mxu0 %vm8157_vm9, %v793_v63  ;;  %vm6714_vm12 = vmxor %vm6675_vm10, %vm8116_vm1  ;;  %5378 = vmatprep.subr.mxu1 %v8013_v21  ;;  %vm6745_vm10 = vcmp.ge.f32.partialorder %v572_v6, 0.0  ;;  %v584_v63 = vmul.f32 0.17364818, %v6385_v13  ;;  %v6768_v6 = vmul.f32 -0.76604444, %v6426_v16 }
 0x117   : > { %5385 = vmatprep.subr.mxu0 %v8013_v21  ;;  %vm6728_vm2 = vmxor %vm6690_vm6, %vm8116_vm1  ;;  %v8165_v58 = vsel %vm6745_vm10, 4294967295, %v8164_v58  ;;  %v6751_v21 = vmul.f32 -0.76604444, %v6385_v13  ;;  %vm8166_vm6 = vcmask 113664  }
 0x118   : > { %vm700_vm14 = vmand %vm8162_vm15, %vm6700_vm3  ;;  %5369 = vmatmul.mubr.msk.f32.vlgmr.msra.gmra.mxu1 %vm8166_vm6, %v6401_v61 }
 0x119   : > { %vm8163_vm9 = vmand %vm6378_vm11, %vm6609_vm4  ;;  %v796_v5 = vsel %vm700_vm14, %v6511_v12, 0.0  ;;  %vm6762_vm4 = vcmp.ge.f32.partialorder %v574_v50, 0.0  ;;  %v8172_v50 = vmov 0  ;;  %5382 = vmatprep.mubr.msk.f32.mxu1 %vm8151_vm8, %v8174_v55 }
 0x11a   : > { %v798_v0 = vsel %vm8163_vm9, %v6236_v34, 0.0  ;;  %vm8167_vm3 = vmmov %vm8166_vm6  ;;  %v8169_v11 = vsel %vm6762_vm4, 4294967295, %v8168_v11  ;;  %vm6777_vm9 = vcmp.ge.f32.partialorder %v593_v37, 0.0 }
 0x11b   : > { %5376 = vmatmul.mubr.msk.f32.vlgmr.msra.gmra.mxu0 %vm8167_vm3, %v6401_v61  ;;  %vm707_vm11 = vmand %vm6583_vm13, %vm6714_vm12  ;;  %v8173_v50 = vsel %vm6777_vm9, 4294967295, %v8172_v50  ;;  %vm6836_vm12 = vcmp.ge.f32.partialorder %v571_v46, 0.0  ;;  %v586_v46 = vmul.f32 0.17364818, %v6412_v15 }
 0x11c   : > { %vm8170_vm6 = vmmov %vm8167_vm3  ;;  %5389 = vmatprep.mubr.msk.f32.mxu0 %vm8151_vm8, %v8174_v55 }
 0x11d   : > { %5379 = vmatpush3.xpose.msk.msra.mxu1 %vm8170_vm6, %v796_v5  ;;  %vm8171_vm15 = vmmov %vm8167_vm3  ;;  %v6785_v5 = vmul.f32 0.9848077, %v6382_v9  ;;  %vm8177_vm6 = vnez %v8086_v43  ;;  %v6895_v43 = vmul.f32 0.9848077, %v6424_v60 }
 0x11e   : > { %5386 = vmatpush3.xpose.msk.msra.mxu0 %vm8171_vm15, %v798_v0  ;;  %v6788_v0 = vmul.f32 0.9848077, %v6437_v33  ;;  %5380 = vmatprep.subr.mxu1 %v8174_v55  ;;  %vm6795_vm3 = vmxor %vm6745_vm10, %vm8116_vm1  ;;  %vm8178_vm15 = vnez %v8100_v35  ;;  %v797_v33 = vsel %vm707_vm11, %v6374_v17, 0.0  ;;  %v596_v35 = vsub.f32 %v584_v63, %v6721_v62 }
 0x11f   : > { %5387 = vmatprep.subr.mxu0 %v8174_v55  ;;  %vm8179_vm14 = vmand %vm8177_vm6, %vm8178_vm15  ;;  %vm6859_vm15 = vcmp.ge.f32.partialorder %v573_v26, 0.0  ;;  %v611_v26 = vsub.f32 %v605_v53, %v6656_v3  ;;  %v585_v53 = vmul.f32 0.17364818, %v6432_v19 }
 0x120   : > { %v6807_v9 = vsel %vm8179_vm14, %v6236_v34, 0.0  ;;  %vm6822_vm10 = vmxor %vm6762_vm4, %vm8116_vm1  ;;  %vm8187_vm14 = vcmask 113664   ;;  %v595_v47 = vsub.f32 %v583_v31, %v6788_v0 }
 0x121   : > { %vm8182_vm13 = vmand %vm6535_vm0, %vm6728_vm2  ;;  %vm8189_vm2 = vnez %v8123_v24  ;;  %v598_v24 = vsub.f32 %v586_v46, %v6785_v5 }
 0x122   : > { %v795_v37 = vsel %vm8182_vm13, %v6567_v28, 0.0  ;;  %vm6843_vm11 = vmxor %vm6777_vm9, %vm8116_vm1  ;;  %vm8192_vm13 = vnez %v8066_v42  ;;  %vm8193_vm9 = vnez %v8070_v20  ;;  %v667_v42 = vsub.f32 %v6848_v30, %v6474_v57 }
 0x123   : > { %5381 = vmatpush3.xpose.msk.msra.mxu1 %vm8187_vm14, %v795_v37  ;;  %vm8188_vm0 = vmmov %vm8187_vm14  ;;  %v8206_v20 = vmov 0  ;;  %v8331_v30 = vmov 0 }
 0x124   : > { %5388 = vmatpush3.xpose.msk.msra.mxu0 %vm8188_vm0, %v797_v33  ;;  %vm710_vm6 = vmand %vm8189_vm2, %vm6795_vm3  ;;  %v6873_v33 = vmul.f32 -0.9396926, %v6432_v19  ;;  %5392 = vmatprep.subr.mxu1 %v8174_v55  ;;  %vm6940_vm2 = vcmp.ge.f32.partialorder %v611_v26, 0.0 }
 0x125   : > { %vm8194_vm4 = vmand %vm8192_vm13, %vm8193_vm9  ;;  %5399 = vmatprep.subr.mxu0 %v8174_v55  ;;  %vm8196_vm9 = vnez %v8114_v23  ;;  %v800_v60 = vsel %vm710_vm6, %v6465_v54, 0.0  ;;  %vm8210_vm6 = vnez %v8153_v51  ;;  %v610_v51 = vmul.f32 -0.17364818, %v6412_v15 }
 0x126   : > { %v6870_v37 = vsel %vm8194_vm4, %v6236_v34, 0.0  ;;  %vm712_vm14 = vmand %vm6660_vm5, %vm6822_vm10  ;;  %vm8195_vm4 = vnez %v8108_v56  ;;  %vm8200_vm10 = vcmask 113664   ;;  %v614_v23 = vsub.f32 %v608_v4, %v6721_v62 }
 0x127   : > { %vm8197_vm0 = vmand %vm8195_vm4, %vm8196_vm9  ;;  %5383 = vmatmul.mubr.msk.f32.vlgmr.msra.gmra.mxu1 %vm8200_vm10, %v6401_v61  ;;  %v802_v31 = vsel %vm712_vm14, %v6511_v12, 0.0  ;;  %v8224_v62 = vmov 0  ;;  %v616_v4 = vsub.f32 %v610_v51, %v6785_v5  ;;  %v8232_v5 = vmov 0 }
 0x128   : > { %v6892_v34 = vsel %vm8197_vm0, %v6465_v54, 0.0  ;;  %vm6900_vm5 = vmxor %vm6836_vm12, %vm8116_vm1  ;;  %5396 = vmatprep.mubr.msk.f32.mxu1 %vm8151_vm8, %v8174_v55  ;;  %v626_v51 = vmul.f32 -0.5, %v6385_v13 }
 0x129   : > { %vm8201_vm13 = vmmov %vm8200_vm10 }
 0x12a   : > { %5390 = vmatmul.mubr.msk.f32.vlgmr.msra.gmra.mxu0 %vm8201_vm13, %v6401_v61  ;;  %vm6922_vm9 = vmxor %vm6859_vm15, %vm8116_vm1  ;;  %vm6928_vm13 = vcmp.ge.f32.partialorder %v596_v35, 0.0  ;;  %v597_v35 = vsub.f32 %v585_v53, %v6895_v43  ;;  %v8219_v53 = vmov 0  ;;  %v632_v63 = vsub.f32 %v626_v51, %v6625_v8 }
 0x12b   : > { %vm8204_vm0 = vmmov %vm8200_vm10  ;;  %v8207_v20 = vsel %vm6928_vm13, 4294967295, %v8206_v20  ;;  %5403 = vmatprep.mubr.msk.f32.mxu0 %vm8151_vm8, %v8174_v55  ;;  %v8249_v8 = vmov 0  ;;  %v641_v51 = vmul.f32 -0.76604444, %v6254_v36 }
 0x12c   : > { %5393 = vmatpush3.xpose.msk.msra.mxu1 %vm8204_vm0, %v800_v60  ;;  %vm8205_vm10 = vmmov %vm8204_vm0  ;;  %v8208_v60 = vmov 0  ;;  %vm8211_vm0 = vnez %v8150_v44  ;;  %vm6999_vm4 = vcmp.ge.f32.partialorder %v597_v35, 0.0  ;;  %v8244_v44 = vmov 0 }
 0x12d   : > { %5400 = vmatpush3.xpose.msk.msra.mxu0 %vm8205_vm10, %v802_v31  ;;  %5394 = vmatprep.subr.mxu1 %v8174_v55  ;;  %vm709_vm3 = vmand %vm6601_vm7, %vm6900_vm5  ;;  %v8209_v60 = vsel %vm6940_vm2, 4294967295, %v8208_v60  ;;  %vm6956_vm5 = vcmp.ge.f32.partialorder %v595_v47, 0.0  ;;  %vm6973_vm7 = vcmp.ge.f32.partialorder %v598_v24, 0.0  ;;  %v607_v31 = vmul.f32 -0.17364818, %v6426_v16 }
 0x12e   : > { %5401 = vmatprep.subr.mxu0 %v8174_v55  ;;  %vm711_vm14 = vmand %vm8210_vm6, %vm6922_vm9  ;;  %v8213_v10 = vsel %vm6956_vm5, 4294967295, %v8212_v10  ;;  %v799_v46 = vsel %vm709_vm3, %v6576_v25, 0.0  ;;  %v8225_v62 = vsel %vm6999_vm4, 4294967295, %v8224_v62  ;;  %v625_v24 = vmul.f32 -0.5, %v6426_v16 }
 0x12f   : > { %v801_v26 = vsel %vm711_vm14, %v6567_v28, 0.0  ;;  %vm6967_vm9 = vmxor %vm6928_vm13, %vm8116_vm1  ;;  %v613_v35 = vsub.f32 %v607_v31, %v6788_v0  ;;  %v8294_v47 = vmov 0  ;;  %v8300_v31 = vmov 0 }
 0x130   : > { %5395 = vmatpush3.xpose.msk.msra.mxu1 %vm8205_vm10, %v799_v46  ;;  %vm8216_vm6 = vmmov %vm8205_vm10  ;;  %vm8223_vm10 = vnez %v8165_v58  ;;  %v609_v46 = vmul.f32 -0.17364818, %v6432_v19  ;;  %v628_v58 = vmul.f32 -0.5, %v6412_v15 }
 0x131   : > { %5402 = vmatpush3.xpose.msk.msra.mxu0 %vm8216_vm6, %v801_v26  ;;  %vm6980_vm3 = vmxor %vm6940_vm2, %vm8116_vm1  ;;  %5406 = vmatprep.subr.mxu1 %v8174_v55  ;;  %vm8226_vm2 = vcmask 113664  }
 0x132   : > { %v8220_v53 = vsel %vm6980_vm3, 4294967295, %v8219_v53  ;;  %5413 = vmatprep.subr.mxu0 %v8174_v55  ;;  %vm6991_vm14 = vmxor %vm6956_vm5, %vm8116_vm1  ;;  %v615_v13 = vsub.f32 %v609_v46, %v6895_v43  ;;  %v623_v43 = vmul.f32 -0.5, %v6254_v36  ;;  %v8254_v46 = vmov 0 }
 0x133   : > { %vm722_vm6 = vmand %vm8223_vm10, %vm6967_vm9  ;;  %5397 = vmatmul.mubr.msk.f32.vlgmr.msra.gmra.mxu1 %vm8226_vm2, %v6401_v61 }
 0x134   : > { %vm8227_vm5 = vmmov %vm8226_vm2  ;;  %v806_v26 = vsel %vm722_vm6, %v6465_v54, 0.0  ;;  %5410 = vmatprep.mubr.msk.f32.mxu1 %vm8151_vm8, %v8174_v55 }
 0x135   : > { %5404 = vmatmul.mubr.msk.f32.vlgmr.msra.gmra.mxu0 %vm8227_vm5, %v6401_v61  ;;  %vm7013_vm9 = vmxor %vm6973_vm7, %vm8116_vm1  ;;  %vm7024_vm5 = vcmp.ge.f32.partialorder %v614_v23, 0.0  ;;  %v8241_v23 = vmov 0 }
 0x136   : > { %vm8230_vm10 = vmmov %vm8226_vm2  ;;  %v8233_v5 = vsel %vm7024_vm5, 4294967295, %v8232_v5  ;;  %5417 = vmatprep.mubr.msk.f32.mxu0 %vm8151_vm8, %v8174_v55 }
 0x137   : > { %5407 = vmatpush3.xpose.msk.msra.mxu1 %vm8230_vm10, %v6263_v40  ;;  %vm8231_vm13 = vmmov %vm8226_vm2  ;;  %v8280_v40 = vsub.f32 %v6768_v6, %v6495_v32 }
 0x138   : > { %5414 = vmatpush3.xpose.msk.msra.mxu0 %vm8231_vm13, %v806_v26  ;;  %vm721_vm2 = vmand %vm6836_vm12, %vm6991_vm14  ;;  %5408 = vmatprep.subr.mxu1 %v8174_v55  ;;  %vm8236_vm12 = vnez %v8169_v11  ;;  %v629_v26 = vsub.f32 %v623_v43, %v6391_v7  ;;  %v627_v7 = vmul.f32 -0.5, %v6432_v19  ;;  %v8298_v43 = vmov 0 }
 0x139   : > { %5415 = vmatprep.subr.mxu0 %v8174_v55  ;;  %vm7035_vm13 = vmxor %vm6999_vm4, %vm8116_vm1  ;;  %vm7051_vm4 = vcmp.ge.f32.partialorder %v616_v4, 0.0  ;;  %v805_v3 = vsel %vm721_vm2, %v6576_v25, 0.0  ;;  %vm7096_vm2 = vcmp.ge.f32.partialorder %v615_v13, 0.0  ;;  %v8264_v13 = vsub.f32 %v6751_v21, %v6453_v49 }
 0x13a   : > { %v8239_v59 = vsel %vm7051_vm4, 4294967295, %v8238_v59  ;;  %vm8240_vm8 = vmand %vm8211_vm0, %vm6843_vm11  ;;  %vm7076_vm11 = vcmp.ge.f32.partialorder %v613_v35, 0.0  ;;  %v8250_v8 = vsel %vm7096_vm2, 4294967295, %v8249_v8  ;;  %vm7124_vm0 = vcmp.ge.f32.partialorder %v632_v63, 0.0 }
 0x13b   : > { %v803_v0 = vsel %vm8240_vm8, %v6374_v17, 0.0  ;;  %vm7066_vm14 = vmxor %vm7024_vm5, %vm8116_vm1  ;;  %v8245_v44 = vsel %vm7076_vm11, 4294967295, %v8244_v44  ;;  %v631_v35 = vsub.f32 %v625_v24, %v6680_v52  ;;  %v8265_v52 = vmov 0 }
 0x13c   : > { %v8242_v23 = vsel %vm7066_vm14, 4294967295, %v8241_v23  ;;  %5409 = vmatpush3.xpose.msk.msra.mxu1 %vm8230_vm10, %v803_v0  ;;  %vm8243_vm3 = vmmov %vm8230_vm10  ;;  %v8271_v21 = vmov 0  ;;  %v8276_v49 = vmov 0  ;;  %v8281_v63 = vmov 0 }
 0x13d   : > { %5416 = vmatpush3.xpose.msk.msra.mxu0 %vm8243_vm3, %v805_v3  ;;  %5420 = vmatprep.subr.mxu1 %v8174_v55  ;;  %vm7087_vm8 = vmxor %vm7051_vm4, %vm8116_vm1  ;;  %v8306_v11 = vmov 0 }
 0x13e   : > { %5427 = vmatprep.subr.mxu0 %v8174_v55  ;;  %vm8251_vm10 = vmmov %vm8243_vm3 }
 0x13f   : > { %5411 = vmatmul.mubr.msk.f32.vlgmr.msra.gmra.mxu1 %vm8251_vm10, %v6401_v61  ;;  %vm8252_vm6 = vmmov %vm8243_vm3 }
 0x140   : > { %5418 = vmatmul.mubr.msk.f32.vlgmr.msra.gmra.mxu0 %vm8252_vm6, %v6401_v61  ;;  %vm8253_vm4 = vmand %vm8236_vm12, %vm7013_vm9  ;;  %vm8262_vm9 = vmmov 0   ;;  %vm8273_vm12 = vcmask 113664  }
 0x141   : > { %v808_v4 = vsel %vm8253_vm4, %v6511_v12, 0.0  ;;  %vm7113_vm3 = vmxor %vm7076_vm11, %vm8116_vm1  ;;  %5424 = vmatprep.mubr.msk.f32.mxu1 %vm8262_vm9, %v8174_v55  ;;  %5431 = vmatprep.mubr.msk.f32.mxu0 %vm8262_vm9, %v8174_v55 }
 0x142   : > { %v8255_v46 = vsel %vm7113_vm3, 4294967295, %v8254_v46  ;;  %vm8256_vm14 = vmmov %vm8252_vm6 }
 0x143   : > { %5421 = vmatpush3.xpose.msk.msra.mxu1 %vm8256_vm14, %v808_v4  ;;  %vm8257_vm10 = vmmov %vm8252_vm6  ;;  %vm8268_vm14 = vnez %v8173_v50  ;;  %v634_v50 = vsub.f32 %v628_v58, %v6634_v2  ;;  %v647_v2 = vsub.f32 %v641_v51, %v6362_v41  ;;  %v8314_v58 = vmov 0 }
 0x144   : > { %5428 = vmatpush3.xpose.msk.msra.mxu0 %vm8257_vm10, %v6283_v48  ;;  %5422 = vmatprep.subr.mxu1 %v8174_v55  ;;  %vm7135_vm4 = vmxor %vm7096_vm2, %vm8116_vm1  ;;  %vm7153_vm10 = vcmp.ge.f32.partialorder %v8264_v13, 0.0  ;;  %vm8269_vm2 = vnez %v8220_v53  ;;  %v633_v53 = vsub.f32 %v627_v7, %v6707_v39  ;;  %v8289_v39 = vmov 0  ;;  %v8365_v13 = vld [vmem:[#allocation9_spill] sm:$0xff] }
 0x145   : > { %5429 = vmatprep.subr.mxu0 %v8174_v55  ;;  %v8266_v52 = vsel %vm7153_vm10, 4294967295, %v8265_v52  ;;  %vm8267_vm6 = vmand %vm6859_vm15, %vm7035_vm13  ;;  %vm8275_vm15 = vnez %v8225_v62  ;;  %v8311_v62 = vsub.f32 %v6733_v38, %v6305_v14  ;;  %v8318_v14 = vmov 0 }
 0x146   : > { %v807_v0 = vsel %vm8267_vm6, %v6567_v28, 0.0  ;;  %vm8270_vm11 = vmand %vm8268_vm14, %vm8269_vm2  ;;  %vm7182_vm6 = vcmp.ge.f32.partialorder %v629_v26, 0.0  ;;  %vm7207_vm14 = vcmp.ge.f32.partialorder %v8280_v40, 0.0 }
 0x147   : > { %v809_v3 = vsel %vm8270_vm11, %v6374_v17, 0.0  ;;  %vm7172_vm3 = vmxor %vm7124_vm0, %vm8116_vm1  ;;  %5423 = vmatpush3.xpose.msk.msra.mxu1 %vm8273_vm12, %v807_v0  ;;  %v8277_v49 = vsel %vm7182_vm6, 4294967295, %v8276_v49  ;;  %vm7189_vm11 = vcmp.ge.f32.partialorder %v631_v35, 0.0  ;;  %v8282_v63 = vsel %vm7207_vm14, 4294967295, %v8281_v63 }
 0x148   : > { %v8272_v21 = vsel %vm7172_vm3, 4294967295, %v8271_v21  ;;  %vm8274_vm9 = vmmov %vm8273_vm12  ;;  %5434 = vmatprep.subr.mxu1 %v8174_v55  ;;  %vm8286_vm3 = vnez %v8242_v23  ;;  %v646_v23 = vmul.f32 -0.76604444, %v6412_v15 }
 0x149   : > { %5430 = vmatpush3.xpose.msk.msra.mxu0 %vm8274_vm9, %v809_v3  ;;  %vm752_vm2 = vmxor %vm7153_vm10, %vm8116_vm1 }
 0x14a   : > { %5441 = vmatprep.subr.mxu0 %v8174_v55  ;;  %vm758_vm12 = vmand %vm7124_vm0, %vm752_vm2  ;;  %vm8296_vm2 = vmmov 0   ;;  %v652_v48 = vsub.f32 %v646_v23, %v6492_v22  ;;  %v8321_v22 = vmov 0 }
 0x14b   : > { %vm8283_vm13 = vmmov %vm8274_vm9  ;;  %v7235_v6 = vsel %vm758_vm12, %v6465_v54, 0.0 }
 0x14c   : > { %5425 = vmatmul.mubr.msk.f32.vlgmr.msra.gmra.mxu1 %vm8283_vm13, %v6401_v61  ;;  %vm8284_vm10 = vmmov %vm8274_vm9  ;;  %vm8285_vm9 = vnez %v8207_v20 }
 0x14d   : > { %5432 = vmatmul.mubr.msk.f32.vlgmr.msra.gmra.mxu0 %vm8284_vm10, %v6401_v61  ;;  %vm8287_vm5 = vmand %vm8285_vm9, %vm8286_vm3  ;;  %5438 = vmatprep.mubr.msk.f32.mxu1 %vm8296_vm2, %v8174_v55  ;;  %vm8297_vm9 = vnez %v8209_v60 }
 0x14e   : > { %v812_v41 = vsel %vm8287_vm5, %v6465_v54, 0.0  ;;  %vm8288_vm0 = vmand %vm6973_vm7, %vm7087_vm8  ;;  %vm7246_vm7 = vcmp.ge.f32.partialorder %v634_v50, 0.0  ;;  %5445 = vmatprep.mubr.msk.f32.mxu0 %vm8296_vm2, %v8174_v55 }
 0x14f   : > { %v814_v32 = vsel %vm8288_vm0, %v6511_v12, 0.0  ;;  %vm7230_vm13 = vmxor %vm7182_vm6, %vm8116_vm1  ;;  %5435 = vmatpush3.xpose.msk.msra.mxu1 %vm8284_vm10, %v812_v41  ;;  %v8295_v47 = vsel %vm7246_vm7, 4294967295, %v8294_v47  ;;  %vm7264_vm0 = vcmp.ge.f32.partialorder %v633_v53, 0.0  ;;  %vm8302_vm6 = vnez %v8213_v10 }
 0x150   : > { %v8290_v39 = vsel %vm7230_vm13, 4294967295, %v8289_v39  ;;  %vm8291_vm5 = vmmov %vm8284_vm10  ;;  %5436 = vmatprep.subr.mxu1 %v8174_v55  ;;  %v8299_v43 = vsel %vm7264_vm0, 4294967295, %v8298_v43  ;;  %vm7268_vm10 = vcmp.ge.f32.partialorder %v647_v2, 0.0 }
 0x151   : > { %5442 = vmatpush3.xpose.msk.msra.mxu0 %vm8291_vm5, %v814_v32  ;;  %vm7242_vm3 = vmxor %vm7189_vm11, %vm8116_vm1  ;;  %v8301_v31 = vsel %vm7268_vm10, 4294967295, %v8300_v31 }
 0x152   : > { %5443 = vmatprep.subr.mxu0 %v8174_v55  ;;  %vm751_vm8 = vmxor %vm7207_vm14, %vm8116_vm1  ;;  %vm8303_vm14 = vnez %v8255_v46  ;;  %v645_v46 = vmul.f32 -0.76604444, %v6432_v19 }
 0x153   : > { %vm757_vm5 = vmand %vm7189_vm11, %vm751_vm8 }
 0x154   : > { %vm8304_vm2 = vmand %vm8302_vm6, %vm8303_vm14  ;;  %v7294_v10 = vsel %vm757_vm5, %v6576_v25, 0.0  ;;  %vm8308_vm6 = vcmask 113664   ;;  %vm7306_vm14 = vcmp.ge.f32.partialorder %v8311_v62, 0.0  ;;  %vm8317_vm5 = vcmp.eq.f32.partialorder %v6254_v36, 0.0 }
 0x155   : > { %v811_v24 = vsel %vm8304_vm2, %v6576_v25, 0.0  ;;  %vm8305_vm12 = vmand %vm8275_vm15, %vm7135_vm4  ;;  %vm8310_vm4 = vnez %v8245_v44  ;;  %vm8316_vm2 = vnez %v8108_v56  ;;  %v8324_v36 = vmov 0 }
 0x156   : > { %v813_v4 = vsel %vm8305_vm12, %v6567_v28, 0.0  ;;  %vm7289_vm13 = vmxor %vm7246_vm7, %vm8116_vm1  ;;  %5437 = vmatpush3.xpose.msk.msra.mxu1 %vm8308_vm6, %v811_v24  ;;  %v651_v38 = vsub.f32 %v645_v46, %v6574_v1  ;;  %v8336_v1 = vmov 0  ;;  %v8357_v44 = vmov 0 }
 0x157   : > { %v8307_v11 = vsel %vm7289_vm13, 4294967295, %v8306_v11  ;;  %vm8309_vm11 = vmmov %vm8308_vm6  ;;  %5448 = vmatprep.subr.mxu1 %v8174_v55 }
 0x158   : > { %5444 = vmatpush3.xpose.msk.msra.mxu0 %vm8309_vm11, %v813_v4  ;;  %vm7315_vm8 = vmxor %vm7264_vm0, %vm8116_vm1  ;;  %vm8320_vm11 = vnez %v8239_v59 }
 0x159   : > { %5455 = vmatprep.subr.mxu0 %v8174_v55  ;;  %v8315_v58 = vsel %vm7315_vm8, 4294967295, %v8314_v58  ;;  %vm764_vm12 = vmxor %vm8316_vm2, %vm8116_vm1  ;;  %vm8323_vm2 = vnez %v8266_v52  ;;  %vm8326_vm8 = vcmask 113664  }
 0x15a   : > { %vm7326_vm6 = vmxor %vm8317_vm5, %vm8116_vm1  ;;  %vm7346_vm5 = vcmp.ge.f32.partialorder %v667_v42, 0.0  ;;  %5439 = vmatmul.mubr.msk.f32.vlgmr.msra.gmra.mxu1 %vm8326_vm8, %v6401_v61  ;;  %v8333_v42 = vld [vmem:[#allocation8_spill] sm:$0xff] }
 0x15b   : > { %v8319_v14 = vsel %vm7326_vm6, 4294967295, %v8318_v14  ;;  %vm7337_vm0 = vmxor %vm7268_vm10, %vm8116_vm1  ;;  %v8325_v36 = vsel %vm7346_vm5, 4294967295, %v8324_v36  ;;  %vm8328_vm6 = vnez %v8233_v5  ;;  %v8339_v5 = vmov 0 }
 0x15c   : > { %v8322_v22 = vsel %vm7337_vm0, 4294967295, %v8321_v22  ;;  %vm770_vm7 = vmand %vm8323_vm2, %vm764_vm12  ;;  %vm8329_vm0 = vnez %v8272_v21  ;;  %vm7394_vm2 = vcmp.ge.f32.partialorder %v652_v48, 0.0  ;;  %vm8348_vm10 = vnez %v8290_v39 }
 0x15d   : > { %vm8327_vm15 = vmmov %vm8326_vm8  ;;  %v7362_v57 = vsel %vm770_vm7, %v6465_v54, 0.0 }
 0x15e   : > { %5446 = vmatmul.mubr.msk.f32.vlgmr.msra.gmra.mxu0 %vm8327_vm15, %v6401_v61  ;;  %vm8330_vm13 = vmand %vm8328_vm6, %vm8329_vm0  ;;  %vm8338_vm0 = vcmp.eq.f32.partialorder %v6426_v16, 0.0  ;;  %v8346_v16 = vmov 0 }
 0x15f   : > { %v818_v56 = vsel %vm8330_vm13, %v6465_v54, 0.0  ;;  %vm7367_vm12 = vmxor %vm7306_vm14, %vm8116_vm1  ;;  %v8335_v54 = vsub.f32 %v6851_v45, %v6415_v18  ;;  %v8345_v18 = vsub.f32 %v6873_v33, %v6442_v27 }
 0x160   : > { %v8332_v30 = vsel %vm7367_vm12, 4294967295, %v8331_v30  ;;  %vm8334_vm15 = vmmov %vm8326_vm8  ;;  %5456 = vmatpush3.xpose.msk.msra.mxu0 %vm8326_vm8, %v818_v56  ;;  %vm8343_vm8 = vmmov 0  }
 0x161   : > { %5449 = vmatpush3.xpose.msk.msra.mxu1 %vm8334_vm15, %v8333_v42  ;;  %vm7381_vm7 = vcmp.ge.f32.partialorder %v8335_v54, 0.0  ;;  %vm7388_vm6 = vmxor %vm8338_vm0, %vm8116_vm1  ;;  %5457 = vmatprep.subr.mxu0 %v8174_v55  ;;  %vm8344_vm0 = vnez %v8282_v63  ;;  %vm7410_vm12 = vcmp.ge.f32.partialorder %v8345_v18, 0.0 }
 0x162   : > { %v8337_v1 = vsel %vm7381_vm7, 4294967295, %v8336_v1  ;;  %v8340_v5 = vsel %vm7388_vm6, 4294967295, %v8339_v5  ;;  %5450 = vmatprep.subr.mxu1 %v8174_v55  ;;  %vm763_vm15 = vmxor %vm7346_vm5, %vm8116_vm1  ;;  %5452 = vmatprep.mubr.msk.f32.mxu1 %vm8343_vm8, %v8174_v55  ;;  %v8347_v16 = vsel %vm7410_vm12, 4294967295, %v8346_v16 }
 0x163   : > { %5459 = vmatprep.mubr.msk.f32.mxu0 %vm8343_vm8, %v8174_v55  ;;  %vm769_vm13 = vmand %vm8344_vm0, %vm763_vm15  ;;  %vm7426_vm0 = vcmp.ge.f32.partialorder %v651_v38, 0.0 }
 0x164   : > { %vm8349_vm5 = vmand %vm8297_vm9, %vm8348_vm10  ;;  %v829_v33 = vsel %vm769_vm13, %v6576_v25, 0.0  ;;  %vm8355_vm9 = vcmask 113664  }
 0x165   : > { %v815_v45 = vsel %vm8349_vm5, %v6374_v17, 0.0  ;;  %vm8350_vm15 = vmand %vm8310_vm4, %vm7242_vm3  ;;  %vm8363_vm3 = vnez %v8319_v14 }
 0x166   : > { %v817_v7 = vsel %vm8350_vm15, %v6576_v25, 0.0  ;;  %vm7434_vm6 = vmxor %vm7381_vm7, %vm8116_vm1  ;;  %5451 = vmatpush3.xpose.msk.msra.mxu1 %vm8355_vm9, %v815_v45 }
 0x167   : > { %vm8356_vm10 = vmmov %vm8355_vm9  ;;  %5462 = vmatprep.subr.mxu1 %v8174_v55 }
 0x168   : > { %5458 = vmatpush3.xpose.msk.msra.mxu0 %vm8356_vm10, %v817_v7  ;;  %vm7449_vm4 = vmxor %vm7410_vm12, %vm8116_vm1 }
 0x169   : > { %5469 = vmatprep.subr.mxu0 %v8174_v55  ;;  %v8358_v44 = vsel %vm7449_vm4, 4294967295, %v8357_v44  ;;  %vm8359_vm13 = vmmov %vm8355_vm9 }
 0x16a   : > { %5453 = vmatmul.mubr.msk.f32.vlgmr.msra.gmra.mxu1 %vm8359_vm13, %v6401_v61  ;;  %vm8360_vm15 = vmmov %vm8355_vm9  ;;  %vm8361_vm9 = vnez %v8307_v11 }
 0x16b   : > { %5460 = vmatmul.mubr.msk.f32.vlgmr.msra.gmra.mxu0 %vm8360_vm15, %v6401_v61  ;;  %vm8362_vm10 = vmand %vm8320_vm11, %vm8361_vm9  ;;  %vm8368_vm15 = vnez %v8250_v8  ;;  %vm8369_vm11 = vnez %v8322_v22  ;;  %vm8370_vm9 = vnez %v8277_v49  ;;  %5466 = vmatprep.mubr.msk.f32.mxu1 %vm8343_vm8, %v8174_v55 }
 0x16c   : > { %v820_v51 = vsel %vm8362_vm10, %v6511_v12, 0.0  ;;  %vm779_vm12 = vmand %vm7306_vm14, %vm8363_vm3  ;;  %5473 = vmatprep.mubr.msk.f32.mxu0 %vm8343_vm8, %v8174_v55 }
 0x16d   : > { %vm8364_vm7 = vmmov %vm8359_vm13  ;;  %vm8367_vm13 = vnez %v8315_v58 }
 0x16e   : > { %5463 = vmatpush3.xpose.msk.msra.mxu1 %vm8364_vm7, %v820_v51  ;;  %vm8366_vm5 = vmmov %vm8364_vm7  ;;  %vm8371_vm7 = vnez %v8340_v5 }
 0x16f   : > { %5470 = vmatpush3.xpose.msk.msra.mxu0 %vm8366_vm5, %v8365_v13  ;;  %vm747_vm4 = vmand %vm8368_vm15, %vm8367_vm13  ;;  %5464 = vmatprep.subr.mxu1 %v8174_v55  ;;  %vm8372_vm5 = vnez %v8325_v36 }
 0x170   : > { %5471 = vmatprep.subr.mxu0 %v8174_v55  ;;  %vm755_vm10 = vmand %vm8370_vm9, %vm8369_vm11  ;;  %v819_v59 = vsel %vm747_vm4, %v6567_v28, 0.0  ;;  %vm8373_vm11 = vcmask 113664  }
 0x171   : > { %vm781_vm13 = vmand %vm8372_vm5, %vm8371_vm7  ;;  %v821_v8 = vsel %vm755_vm10, %v6374_v17, 0.0  ;;  %vm8375_vm7 = vnez %v8295_v47 }
 0x172   : > { %vm754_vm15 = vmxor %vm7394_vm2, %vm8116_vm1  ;;  %v7498_v52 = vsel %vm781_vm13, %v6576_v25, 0.0  ;;  %5465 = vmatpush3.xpose.msk.msra.mxu1 %vm8373_vm11, %v819_v59 }
 0x173   : > { %vm8374_vm9 = vmmov %vm8373_vm11  ;;  %5476 = vmatprep.subr.mxu1 %v8174_v55 }
 0x174   : > { %5472 = vmatpush3.xpose.msk.msra.mxu0 %vm8374_vm9, %v821_v8  ;;  %vm760_vm4 = vmand %vm8375_vm7, %vm754_vm15  ;;  %vm8380_vm15 = vnez %v8299_v43 }
 0x175   : > { %5483 = vmatprep.subr.mxu0 %v8174_v55  ;;  %vm8376_vm10 = vmmov %vm8374_vm9  ;;  %v826_v25 = vsel %vm760_vm4, %v6511_v12, 0.0 }
 0x176   : > { %5467 = vmatmul.mubr.msk.f32.vlgmr.msra.gmra.mxu1 %vm8376_vm10, %v6401_v61  ;;  %vm8377_vm5 = vmmov %vm8374_vm9 }
 0x177   : > { %5474 = vmatmul.mubr.msk.f32.vlgmr.msra.gmra.mxu0 %vm8377_vm5, %v6401_v61  ;;  %vm753_vm13 = vmxor %vm7426_vm0, %vm8116_vm1  ;;  %5480 = vmatprep.mubr.msk.f32.mxu1 %vm8343_vm8, %v8174_v55 }
 0x178   : > { %vm8378_vm11 = vmmov %vm8377_vm5  ;;  %5487 = vmatprep.mubr.msk.f32.mxu0 %vm8343_vm8, %v8174_v55 }
 0x179   : > { %5477 = vmatpush3.xpose.msk.msra.mxu1 %vm8378_vm11, %v7235_v6  ;;  %vm8379_vm9 = vmmov %vm8377_vm5 }
 0x17a   : > { %5484 = vmatpush3.xpose.msk.msra.mxu0 %vm8379_vm9, %v826_v25  ;;  %5478 = vmatprep.subr.mxu1 %v8174_v55  ;;  %vm759_vm7 = vmand %vm8380_vm15, %vm753_vm13  ;;  %vm8387_vm15 = vnez %v8301_v31 }
 0x17b   : > { %5485 = vmatprep.subr.mxu0 %v8174_v55  ;;  %v825_v0 = vsel %vm759_vm7, %v6567_v28, 0.0  ;;  %vm8381_vm4 = vmmov %vm8377_vm5  ;;  %vm8388_vm7 = vnez %v8332_v30 }
 0x17c   : > { %vm8382_vm10 = vmmov %vm8381_vm4 }
 0x17d   : > { %5479 = vmatpush3.xpose.msk.msra.mxu1 %vm8381_vm4, %v7294_v10  ;;  %vm8383_vm5 = vmmov %vm8381_vm4 }
 0x17e   : > { %5486 = vmatpush3.xpose.msk.msra.mxu0 %vm8382_vm10, %v825_v0  ;;  %5490 = vmatprep.subr.mxu1 %v8174_v55  ;;  %vm8384_vm13 = vmmov %vm8381_vm4 }
 0x17f   : > { %5497 = vmatprep.subr.mxu0 %v8174_v55  ;;  %vm8385_vm11 = vmmov %vm8381_vm4 }
 0x180   : > { %5481 = vmatmul.mubr.msk.f32.vlgmr.msra.gmra.mxu1 %vm8383_vm5, %v6401_v61  ;;  %vm8386_vm9 = vmmov %vm8381_vm4 }
 0x181   : > { %5488 = vmatmul.mubr.msk.f32.vlgmr.msra.gmra.mxu0 %vm8384_vm13, %v6401_v61  ;;  %5491 = vmatpush3.xpose.msk.msra.mxu1 %vm8385_vm11, %v6807_v9  ;;  %vm8389_vm4 = vmand %vm8387_vm15, %vm8388_vm7 }
 0x182   : > { %5498 = vmatpush3.xpose.msk.msra.mxu0 %vm8386_vm9, %v7362_v57  ;;  %5492 = vmatprep.subr.mxu1 %v8174_v55  ;;  %v827_v9 = vsel %vm8389_vm4, %v6374_v17, 0.0  ;;  %vm8390_vm10 = vmmov %vm8383_vm5 }
 0x183   : > { %5499 = vmatprep.subr.mxu0 %v8174_v55  ;;  %5494 = vmatprep.mubr.msk.f32.mxu1 %vm8343_vm8, %v8174_v55  ;;  %vm8391_vm13 = vmmov %vm8383_vm5 }
 0x184   : > { %5501 = vmatprep.mubr.msk.f32.mxu0 %vm8343_vm8, %v8174_v55  ;;  %vm8392_vm11 = vmmov %vm8383_vm5 }
 0x185   : > { %5493 = vmatpush3.xpose.msk.msra.mxu1 %vm8390_vm10, %v827_v9  ;;  %vm8393_vm9 = vmand %vm7394_vm2, %vm7434_vm6  ;;  %vm8396_vm6 = vnez %v8358_v44 }
 0x186   : > { %5500 = vmatpush3.xpose.msk.msra.mxu0 %vm8383_vm5, %v829_v33  ;;  %5504 = vmatprep.subr.mxu1 %v8174_v55  ;;  %v832_v3 = vsel %vm8393_vm9, %v6511_v12, 0.0  ;;  %vm8394_vm15 = vmmov %vm8383_vm5 }
 0x187   : > { %5511 = vmatprep.subr.mxu0 %v8174_v55  ;;  %vm8395_vm7 = vmmov %vm8383_vm5 }
 0x188   : > { %5495 = vmatmul.mubr.msk.f32.vlgmr.msra.gmra.mxu1 %vm8391_vm13, %v6401_v61  ;;  %vm8397_vm2 = vmand %vm7426_vm0, %vm8396_vm6  ;;  %vm8401_vm13 = vnez %v8337_v1  ;;  %vm8407_vm6 = vnez %v8347_v16 }
 0x189   : > { %5502 = vmatmul.mubr.msk.f32.vlgmr.msra.gmra.mxu0 %vm8392_vm11, %v6401_v61  ;;  %5505 = vmatpush3.xpose.msk.msra.mxu1 %vm8394_vm15, %v832_v3  ;;  %v831_v21 = vsel %vm8397_vm2, %v6567_v28, 0.0  ;;  %vm8398_vm4 = vmmov %vm8383_vm5  ;;  %vm8400_vm5 = vcmp.eq.f32.partialorder %v6412_v15, 0.0  ;;  %vm8406_vm15 = vcmp.eq.f32.partialorder %v6432_v19, 0.0 }
 0x18a   : > { %5512 = vmatpush3.xpose.msk.msra.mxu0 %vm8395_vm7, %v6870_v37  ;;  %5506 = vmatprep.subr.mxu1 %v8174_v55  ;;  %v833_v37 = vsel %vm779_vm12, %v6374_v17, 0.0  ;;  %vm8399_vm10 = vmmov %vm8398_vm4 }
 0x18b   : > { %5513 = vmatprep.subr.mxu0 %v8174_v55  ;;  %5508 = vmatprep.mubr.msk.f32.mxu1 %vm8343_vm8, %v8174_v55  ;;  %vm778_vm0 = vmxor %vm8400_vm5, %vm8116_vm1 }
 0x18c   : > { %5515 = vmatprep.mubr.msk.f32.mxu0 %vm8343_vm8, %v8174_v55  ;;  %vm784_vm11 = vmand %vm8401_vm13, %vm778_vm0 }
 0x18d   : > { %5507 = vmatpush3.xpose.msk.msra.mxu1 %vm8398_vm4, %v831_v21  ;;  %vm8402_vm9 = vmmov %vm8398_vm4  ;;  %v838_v17 = vsel %vm784_vm11, %v6511_v12, 0.0  ;;  %v7629_v12 = vld [vmem:[#allocation4] sm:$0x3] }
 0x18e   : > { %5514 = vmatpush3.xpose.msk.msra.mxu0 %vm8399_vm10, %v833_v37  ;;  %5518 = vmatprep.subr.mxu1 %v8174_v55  ;;  %vm8403_vm14 = vmmov %vm8398_vm4 }
 0x18f   : > { %5525 = vmatprep.subr.mxu0 %v8174_v55  ;;  %vm8404_vm12 = vmmov %vm8398_vm4 }
 0x190   : > { %5509 = vmatmul.mubr.msk.f32.vlgmr.msra.gmra.mxu1 %vm8402_vm9, %v6401_v61  ;;  %vm8405_vm3 = vmmov %vm8398_vm4 }
 0x191   : > { %5516 = vmatmul.mubr.msk.f32.vlgmr.msra.gmra.mxu0 %vm8403_vm14, %v6401_v61  ;;  %5519 = vmatpush3.xpose.msk.msra.mxu1 %vm8404_vm12, %v6892_v34  ;;  %vm777_vm7 = vmxor %vm8406_vm15, %vm8116_vm1 }
 0x192   : > { %5526 = vmatpush3.xpose.msk.msra.mxu0 %vm8405_vm3, %v838_v17  ;;  %5520 = vmatprep.subr.mxu1 %v8174_v55  ;;  %vm783_vm2 = vmand %vm8407_vm6, %vm777_vm7 }
 0x193   : > { %5527 = vmatprep.subr.mxu0 %v8174_v55  ;;  %5522 = vmatprep.mubr.msk.f32.mxu1 %vm8343_vm8, %v8174_v55  ;;  %v837_v15 = vsel %vm783_vm2, %v6567_v28, 0.0  ;;  %vm8408_vm4 = vmmov %vm8405_vm3 }
 0x194   : > { %5529 = vmatprep.mubr.msk.f32.mxu0 %vm8343_vm8, %v8174_v55  ;;  %vm8409_vm10 = vmmov %vm8405_vm3 }
 0x195   : > { %5521 = vmatpush3.xpose.msk.msra.mxu1 %vm8408_vm4, %v7498_v52  ;;  %vm8410_vm1 = vmmov %vm8405_vm3 }
 0x196   : > { %5528 = vmatpush3.xpose.msk.msra.mxu0 %vm8409_vm10, %v837_v15  ;;  %5532 = vmatprep.subr.mxu1 %v8174_v55  ;;  %vm8411_vm5 = vmmov %vm8410_vm1 }
 0x197   : > { %5542 = vmatprep.subr.mxu0 %v8174_v55  ;;  %vm8412_vm0 = vmmov %vm8410_vm1 }
 0x198   : > { %5523 = vmatmul.mubr.msk.f32.vlgmr.msra.gmra.mxu1 %vm8410_vm1, %v6401_v61  ;;  %vm8413_vm13 = vmmov %vm8412_vm0 }
 0x199   : > { %5530 = vmatmul.mubr.msk.f32.vlgmr.msra.gmra.mxu0 %vm8411_vm5, %v6401_v61  ;;  %5534 = vmatprep.mubr.msk.f32.mxu1 %vm8343_vm8, %v8174_v55  ;;  %vm8414_vm11 = vmmov %vm8412_vm0 }
 0x19a   : > { %5544 = vmatprep.mubr.msk.f32.mxu0 %vm8343_vm8, %v8174_v55  ;;  %vm8415_vm9 = vmmov %vm8412_vm0 }
 0x19b   : > { %vm8416_vm14 = vmmov %vm8412_vm0 }
 0x19c   : > { %vm8417_vm12 = vmmov %vm8412_vm0 }
 0x19d   : > { %vm8418_vm3 = vmmov %vm8412_vm0 }
 0x19e   : > { %vm8419_vm15 = vmmov %vm8412_vm0 }
 0x19f   : > { %vm8420_vm7 = vmmov %vm8412_vm0 }
 0x1a0   : > { %vm8421_vm6 = vmmov %vm8412_vm0 }
 0x1a1   : > { %vm8422_vm2 = vmmov %vm8412_vm0 }
 0x1a2   : > { %vm8423_vm4 = vmmov %vm8412_vm0 }
 0x1a3   : > { %vm8424_vm10 = vmmov %vm8412_vm0 }
 0x1a4   : > { %vm8425_vm1 = vmmov %vm8412_vm0 }
 0x1a5   : > { %vm8426_vm5 = vmmov %vm8412_vm0 }
 0x1b4   : > { %v917_v19 = vpop.f32.mrf.mxu0 }
 0x1b5   : > { %5533 = vmatpush3.xpose.msk.msra.mxu1 %vm8412_vm0, %v917_v19 }
 0x1b6   : > { %v5349_v28 = vpop.f32.mrf.mxu0  ;;  %5537 = vmatprep.subr.mxu1 %v8174_v55 }
 0x1b8   : > { %5535 = vmatmul.mubr.msk.f32.vlgmr.msra.gmra.mxu1 %vm8413_vm13, %v7629_v12  ;;  %vm8427_vm13 = vmmov %vm8412_vm0 }
 0x1b9   : > { %5539 = vmatprep.mubr.msk.f32.mxu1 %vm8343_vm8, %v8174_v55 }
 0x1cd   : > { %v1069_v34 = vpop.f32.mrf.mxu0 }
 0x1ce   : > { %v993_v61 = vpop.f32.mrf.mxu1  ;;  %5543 = vmatpush3.xpose.msk.msra.mxu0 %vm8415_vm9, %v1069_v34  ;;  %vm8429_vm9 = vmmov %vm8412_vm0 }
 0x1cf   : > { %5538 = vmatpush3.xpose.msk.msra.mxu1 %vm8414_vm11, %v993_v61  ;;  %v5363_v50 = vpop.f32.mrf.mxu0  ;;  %5552 = vmatprep.subr.mxu0 %v8174_v55  ;;  %vm8428_vm11 = vmmov %vm8412_vm0 }
 0x1d0   : > { %v5356_v49 = vpop.f32.mrf.mxu1  ;;  %5547 = vmatprep.subr.mxu1 %v8174_v55 }
 0x1d1   : > { %5545 = vmatmul.mubr.msk.f32.vlgmr.msra.gmra.mxu0 %vm8417_vm12, %v7629_v12  ;;  %vm8431_vm12 = vmmov %vm8412_vm0 }
 0x1d2   : > { %5540 = vmatmul.mubr.msk.f32.vlgmr.msra.gmra.mxu1 %vm8416_vm14, %v7629_v12  ;;  %5554 = vmatprep.mubr.msk.f32.mxu0 %vm8343_vm8, %v8174_v55  ;;  %vm8430_vm14 = vmmov %vm8412_vm0 }
 0x1d3   : > { %5549 = vmatprep.mubr.msk.f32.mxu1 %vm8343_vm8, %v8174_v55 }
 0x1d8   : > { %v1145_v29 = vpop.f32.mrf.mxu1 }
 0x1d9   : > { %5548 = vmatpush3.xpose.msk.msra.mxu1 %vm8418_vm3, %v1145_v29  ;;  %vm8432_vm3 = vmmov %vm8412_vm0 }
 0x1da   : > { %v5370_v2 = vpop.f32.mrf.mxu1  ;;  %5557 = vmatprep.subr.mxu1 %v8174_v55 }
 0x1db   : > { %v1221_v53 = vpop.f32.mrf.mxu0 }
 0x1dc   : > { %5553 = vmatpush3.xpose.msk.msra.mxu0 %vm8419_vm15, %v1221_v53  ;;  %5550 = vmatmul.mubr.msk.f32.vlgmr.msra.gmra.mxu1 %vm8420_vm7, %v7629_v12  ;;  %vm8433_vm15 = vmmov %vm8412_vm0 }
 0x1dd   : > { %v5377_v40 = vpop.f32.mrf.mxu0  ;;  %5562 = vmatprep.subr.mxu0 %v8174_v55  ;;  %5559 = vmatprep.mubr.msk.f32.mxu1 %vm8343_vm8, %v8174_v55  ;;  %vm8434_vm7 = vmmov %vm8412_vm0 }
 0x1df   : > { %5555 = vmatmul.mubr.msk.f32.vlgmr.msra.gmra.mxu0 %vm8421_vm6, %v7629_v12  ;;  %vm8435_vm6 = vmmov %vm8412_vm0 }
 0x1e0   : > { %5564 = vmatprep.mubr.msk.f32.mxu0 %vm8343_vm8, %v8174_v55 }
 0x1e7   : > { %v1297_v63 = vpop.f32.mrf.mxu1 }
 0x1e8   : > { %5558 = vmatpush3.xpose.msk.msra.mxu1 %vm8422_vm2, %v1297_v63  ;;  %vm8436_vm2 = vmmov %vm8412_vm0 }
 0x1e9   : > { %v5384_v32 = vpop.f32.mrf.mxu1  ;;  %5567 = vmatprep.subr.mxu1 %v8174_v55 }
 0x1ea   : > { %v1373_v41 = vpop.f32.mrf.mxu0 }
 0x1eb   : > { %5563 = vmatpush3.xpose.msk.msra.mxu0 %vm8423_vm4, %v1373_v41  ;;  %5560 = vmatmul.mubr.msk.f32.vlgmr.msra.gmra.mxu1 %vm8424_vm10, %v7629_v12  ;;  %vm8437_vm4 = vmmov %vm8412_vm0 }
 0x1ec   : > { %v5391_v39 = vpop.f32.mrf.mxu0  ;;  %5572 = vmatprep.subr.mxu0 %v8174_v55  ;;  %5569 = vmatprep.mubr.msk.f32.mxu1 %vm8343_vm8, %v8174_v55  ;;  %vm8438_vm10 = vmmov %vm8412_vm0 }
 0x1ee   : > { %5565 = vmatmul.mubr.msk.f32.vlgmr.msra.gmra.mxu0 %vm8425_vm1, %v7629_v12  ;;  %vm8439_vm1 = vmmov %vm8412_vm0 }
 0x1ef   : > { %5574 = vmatprep.mubr.msk.f32.mxu0 %vm8343_vm8, %v8174_v55 }
 0x1f3   : > { %v1449_v6 = vpop.f32.mrf.mxu1 }
 0x1f4   : > { %5568 = vmatpush3.xpose.msk.msra.mxu1 %vm8426_vm5, %v1449_v6  ;;  %vm8440_vm5 = vmmov %vm8412_vm0 }
 0x1f5   : > { %v1525_v20 = vpop.f32.mrf.mxu0  ;;  %v5398_v47 = vpop.f32.mrf.mxu1  ;;  %5577 = vmatprep.subr.mxu1 %v8174_v55 }
 0x1f6   : > { %5573 = vmatpush3.xpose.msk.msra.mxu0 %vm8412_vm0, %v1525_v20 }
 0x1f7   : > { %v5405_v23 = vpop.f32.mrf.mxu0  ;;  %5582 = vmatprep.subr.mxu0 %v8174_v55  ;;  %5570 = vmatmul.mubr.msk.f32.vlgmr.msra.gmra.mxu1 %vm8427_vm13, %v7629_v12  ;;  %vm8441_vm13 = vmmov %vm8412_vm0 }
 0x1f8   : > { %5579 = vmatprep.mubr.msk.f32.mxu1 %vm8343_vm8, %v8174_v55 }
 0x1f9   : > { %5575 = vmatmul.mubr.msk.f32.vlgmr.msra.gmra.mxu0 %vm8428_vm11, %v7629_v12  ;;  %vm8442_vm11 = vmmov %vm8412_vm0 }
 0x1fa   : > { %5584 = vmatprep.mubr.msk.f32.mxu0 %vm8343_vm8, %v8174_v55 }
 0x1ff   : > { %v1601_v43 = vpop.f32.mrf.mxu1 }
 0x200   : > { %v1677_v31 = vpop.f32.mrf.mxu0  ;;  %5578 = vmatpush3.xpose.msk.msra.mxu1 %vm8429_vm9, %v1601_v43  ;;  %vm8443_vm9 = vmmov %vm8412_vm0 }
 0x201   : > { %5583 = vmatpush3.xpose.msk.msra.mxu0 %vm8430_vm14, %v1677_v31  ;;  %v5412_v24 = vpop.f32.mrf.mxu1  ;;  %5587 = vmatprep.subr.mxu1 %v8174_v55  ;;  %vm8444_vm14 = vmmov %vm8412_vm0 }
 0x202   : > { %v5419_v4 = vpop.f32.mrf.mxu0  ;;  %5592 = vmatprep.subr.mxu0 %v8174_v55 }
 0x203   : > { %5580 = vmatmul.mubr.msk.f32.vlgmr.msra.gmra.mxu1 %vm8431_vm12, %v7629_v12  ;;  %vm8445_vm12 = vmmov %vm8412_vm0 }
 0x204   : > { %5585 = vmatmul.mubr.msk.f32.vlgmr.msra.gmra.mxu0 %vm8432_vm3, %v7629_v12  ;;  %5589 = vmatprep.mubr.msk.f32.mxu1 %vm8343_vm8, %v8174_v55  ;;  %vm8446_vm3 = vmmov %vm8412_vm0 }
 0x205   : > { %5594 = vmatprep.mubr.msk.f32.mxu0 %vm8343_vm8, %v8174_v55 }
 0x20c   : > { %v1753_v11 = vpop.f32.mrf.mxu1 }
 0x20d   : > { %v1829_v10 = vpop.f32.mrf.mxu0  ;;  %5588 = vmatpush3.xpose.msk.msra.mxu1 %vm8433_vm15, %v1753_v11  ;;  %vm8447_vm15 = vmmov %vm8412_vm0 }
 0x20e   : > { %5593 = vmatpush3.xpose.msk.msra.mxu0 %vm8434_vm7, %v1829_v10  ;;  %v5426_v46 = vpop.f32.mrf.mxu1  ;;  %5597 = vmatprep.subr.mxu1 %v8174_v55  ;;  %vm8448_vm7 = vmmov %vm8412_vm0 }
 0x20f   : > { %v5433_v62 = vpop.f32.mrf.mxu0  ;;  %5602 = vmatprep.subr.mxu0 %v8174_v55 }
 0x210   : > { %5590 = vmatmul.mubr.msk.f32.vlgmr.msra.gmra.mxu1 %vm8435_vm6, %v7629_v12  ;;  %vm8449_vm6 = vmmov %vm8412_vm0 }
 0x211   : > { %5595 = vmatmul.mubr.msk.f32.vlgmr.msra.gmra.mxu0 %vm8436_vm2, %v7629_v12  ;;  %5599 = vmatprep.mubr.msk.f32.mxu1 %vm8343_vm8, %v8174_v55  ;;  %vm8450_vm2 = vmmov %vm8412_vm0 }
 0x212   : > { %5604 = vmatprep.mubr.msk.f32.mxu0 %vm8343_vm8, %v8174_v55 }
 0x21a   : > { %v1905_v26 = vpop.f32.mrf.mxu1 }
 0x21b   : > { %5598 = vmatpush3.xpose.msk.msra.mxu1 %vm8437_vm4, %v1905_v26  ;;  %vm8451_vm4 = vmmov %vm8412_vm0 }
 0x21c   : > { %v5440_v48 = vpop.f32.mrf.mxu1  ;;  %5607 = vmatprep.subr.mxu1 %v8174_v55 }
 0x21e   : > { %v1981_v58 = vpop.f32.mrf.mxu0  ;;  %5600 = vmatmul.mubr.msk.f32.vlgmr.msra.gmra.mxu1 %vm8439_vm1, %v7629_v12  ;;  %vm8453_vm1 = vmmov %vm8412_vm0 }
 0x21f   : > { %5603 = vmatpush3.xpose.msk.msra.mxu0 %vm8438_vm10, %v1981_v58  ;;  %5609 = vmatprep.mubr.msk.f32.mxu1 %vm8343_vm8, %v8174_v55  ;;  %vm8452_vm10 = vmmov %vm8412_vm0 }
 0x220   : > { %v5447_v14 = vpop.f32.mrf.mxu0  ;;  %5612 = vmatprep.subr.mxu0 %v8174_v55 }
 0x222   : > { %5605 = vmatmul.mubr.msk.f32.vlgmr.msra.gmra.mxu0 %vm8440_vm5, %v7629_v12  ;;  %vm8454_vm5 = vmmov %vm8412_vm0 }
 0x223   : > { %5614 = vmatprep.mubr.msk.f32.mxu0 %vm8343_vm8, %v8174_v55 }
 0x22a   : > { %v2057_v22 = vpop.f32.mrf.mxu1 }
 0x22b   : > { %v2133_v36 = vpop.f32.mrf.mxu0  ;;  %5608 = vmatpush3.xpose.msk.msra.mxu1 %vm8412_vm0, %v2057_v22 }
 0x22c   : > { %5613 = vmatpush3.xpose.msk.msra.mxu0 %vm8441_vm13, %v2133_v36  ;;  %v5454_v56 = vpop.f32.mrf.mxu1  ;;  %5617 = vmatprep.subr.mxu1 %v8174_v55  ;;  %vm8455_vm13 = vmmov %vm8412_vm0 }
 0x22d   : > { %v5461_v38 = vpop.f32.mrf.mxu0  ;;  %5622 = vmatprep.subr.mxu0 %v8174_v55 }
 0x22e   : > { %5610 = vmatmul.mubr.msk.f32.vlgmr.msra.gmra.mxu1 %vm8442_vm11, %v7629_v12  ;;  %vm8456_vm11 = vmmov %vm8412_vm0 }
 0x22f   : > { %5615 = vmatmul.mubr.msk.f32.vlgmr.msra.gmra.mxu0 %vm8443_vm9, %v7629_v12  ;;  %5619 = vmatprep.mubr.msk.f32.mxu1 %vm8343_vm8, %v8174_v55  ;;  %vm8457_vm9 = vmmov %vm8412_vm0 }
 0x230   : > { %5624 = vmatprep.mubr.msk.f32.mxu0 %vm8343_vm8, %v8174_v55 }
 0x236   : > { %v2209_v57 = vpop.f32.mrf.mxu1 }
 0x237   : > { %v2285_v30 = vpop.f32.mrf.mxu0  ;;  %5618 = vmatpush3.xpose.msk.msra.mxu1 %vm8444_vm14, %v2209_v57  ;;  %vm8458_vm14 = vmmov %vm8412_vm0 }
 0x238   : > { %5623 = vmatpush3.xpose.msk.msra.mxu0 %vm8445_vm12, %v2285_v30  ;;  %v5468_v42 = vpop.f32.mrf.mxu1  ;;  %5627 = vmatprep.subr.mxu1 %v8174_v55  ;;  %vm8459_vm12 = vmmov %vm8412_vm0 }
 0x239   : > { %v5475_v54 = vpop.f32.mrf.mxu0  ;;  %5632 = vmatprep.subr.mxu0 %v8174_v55 }
 0x23a   : > { %5620 = vmatmul.mubr.msk.f32.vlgmr.msra.gmra.mxu1 %vm8446_vm3, %v7629_v12  ;;  %vm8460_vm3 = vmmov %vm8412_vm0 }
 0x23b   : > { %5625 = vmatmul.mubr.msk.f32.vlgmr.msra.gmra.mxu0 %vm8447_vm15, %v7629_v12  ;;  %5629 = vmatprep.mubr.msk.f32.mxu1 %vm8343_vm8, %v8174_v55  ;;  %vm8461_vm15 = vmmov %vm8412_vm0 }
 0x23c   : > { %5634 = vmatprep.mubr.msk.f32.mxu0 %vm8343_vm8, %v8174_v55 }
 0x240   : > { %v2361_v1 = vpop.f32.mrf.mxu1 }
 0x241   : > { %v2437_v5 = vpop.f32.mrf.mxu0  ;;  %5628 = vmatpush3.xpose.msk.msra.mxu1 %vm8448_vm7, %v2361_v1  ;;  %vm8462_vm7 = vmmov %vm8412_vm0 }
 0x242   : > { %5633 = vmatpush3.xpose.msk.msra.mxu0 %vm8449_vm6, %v2437_v5  ;;  %v5482_v35 = vpop.f32.mrf.mxu1  ;;  %5637 = vmatprep.subr.mxu1 %v8174_v55 }
 0x243   : > { %v5489_v18 = vpop.f32.mrf.mxu0  ;;  %5642 = vmatprep.subr.mxu0 %v8174_v55 }
 0x244   : > { %5630 = vmatmul.mubr.msk.f32.vlgmr.msra.gmra.mxu1 %vm8450_vm2, %v7629_v12 }
 0x245   : > { %5635 = vmatmul.mubr.msk.f32.vlgmr.msra.gmra.mxu0 %vm8451_vm4, %v7629_v12  ;;  %5639 = vmatprep.mubr.msk.f32.mxu1 %vm8343_vm8, %v8174_v55 }
 0x246   : > { %5644 = vmatprep.mubr.msk.f32.mxu0 %vm8343_vm8, %v8174_v55 }
 0x248   : > { %v2513_v16 = vpop.f32.mrf.mxu1 }
 0x249   : > { %v2589_v45 = vpop.f32.mrf.mxu0  ;;  %5638 = vmatpush3.xpose.msk.msra.mxu1 %vm8452_vm10, %v2513_v16 }
 0x24a   : > { %5643 = vmatpush3.xpose.msk.msra.mxu0 %vm8453_vm1, %v2589_v45  ;;  %v5496_v7 = vpop.f32.mrf.mxu1  ;;  %5647 = vmatprep.subr.mxu1 %v8174_v55 }
 0x24b   : > { %v5503_v27 = vpop.f32.mrf.mxu0  ;;  %5652 = vmatprep.subr.mxu0 %v8174_v55 }
 0x24c   : > { %5640 = vmatmul.mubr.msk.f32.vlgmr.msra.gmra.mxu1 %vm8454_vm5, %v7629_v12 }
 0x24d   : > { %5645 = vmatmul.mubr.msk.f32.vlgmr.msra.gmra.mxu0 %vm8412_vm0, %v7629_v12  ;;  %5649 = vmatprep.mubr.msk.f32.mxu1 %vm8343_vm8, %v8174_v55 }
 0x24e   : > { %5654 = vmatprep.mubr.msk.f32.mxu0 %vm8343_vm8, %v8174_v55 }
 0x250   : > { %v2665_v33 = vpop.f32.mrf.mxu1 }
 0x251   : > { %v2741_v60 = vpop.f32.mrf.mxu0  ;;  %5648 = vmatpush3.xpose.msk.msra.mxu1 %vm8455_vm13, %v2665_v33 }
 0x252   : > { %5653 = vmatpush3.xpose.msk.msra.mxu0 %vm8456_vm11, %v2741_v60  ;;  %v5510_v44 = vpop.f32.mrf.mxu1  ;;  %5657 = vmatprep.subr.mxu1 %v8174_v55 }
 0x253   : > { %v5517_v51 = vpop.f32.mrf.mxu0  ;;  %5662 = vmatprep.subr.mxu0 %v8174_v55 }
 0x254   : > { %5650 = vmatmul.mubr.msk.f32.vlgmr.msra.gmra.mxu1 %vm8457_vm9, %v7629_v12 }
 0x255   : > { %5655 = vmatmul.mubr.msk.f32.vlgmr.msra.gmra.mxu0 %vm8458_vm14, %v7629_v12  ;;  %5659 = vmatprep.mubr.msk.f32.mxu1 %vm8343_vm8, %v8174_v55 }
 0x256   : > { %5664 = vmatprep.mubr.msk.f32.mxu0 %vm8343_vm8, %v8174_v55  ;;  %vm4958_vm8 = vcmask 9216  }
 0x258   : > { %v2817_v13 = vpop.f32.mrf.mxu1 }
 0x259   : > { %v2893_v59 = vpop.f32.mrf.mxu0  ;;  %5658 = vmatpush3.xpose.msk.msra.mxu1 %vm8459_vm12, %v2817_v13 }
 0x25a   : > { %5663 = vmatpush3.xpose.msk.msra.mxu0 %vm8460_vm3, %v2893_v59  ;;  %v5524_v8 = vpop.f32.mrf.mxu1 }
 0x25b   : > { %v5531_v52 = vpop.f32.mrf.mxu0 }
 0x25c   : > { %5660 = vmatmul.mubr.msk.f32.vlgmr.msra.gmra.mxu1 %vm8461_vm15, %v7629_v12 }
 0x25d   : > { %5665 = vmatmul.mubr.msk.f32.vlgmr.msra.gmra.mxu0 %vm8462_vm7, %v7629_v12 }
 0x278   : > { %v7786_v25 = vpop.f32.mrf.mxu1 }
 0x279   : > { %v4871_v48 = vmul.f32 %v7786_v25, %v7786_v25 }
 0x27a   : > { %v5536_v0 = vpop.f32.mrf.mxu1 }
 0x291   : > { %v7790_v55 = vpop.f32.mrf.mxu0 }
 0x292   : > { %v7788_v9 = vpop.f32.mrf.mxu1  ;;  %v4873_v1 = vmul.f32 %v7790_v55, %v7790_v55 }
 0x293   : > { %v5546_v21 = vpop.f32.mrf.mxu0  ;;  %v4872_v56 = vmul.f32 %v7788_v9, %v7788_v9 }
 0x294   : > { %v5541_v3 = vpop.f32.mrf.mxu1 }
 0x29c   : > { %v7792_v37 = vpop.f32.mrf.mxu1 }
 0x29d   : > { %v4877_v14 = vmul.f32 %v7792_v37, %v7792_v37 }
 0x29e   : > { %v5551_v15 = vpop.f32.mrf.mxu1 }
 0x29f   : > { %v7794_v17 = vpop.f32.mrf.mxu0  ;;  %v4880_v22 = vadd.f32 %v4877_v14, %v4871_v48 }
 0x2a0   : > { %v4878_v38 = vmul.f32 %v7794_v17, %v7794_v17 }
 0x2a1   : > { %v5556_v19 = vpop.f32.mrf.mxu0 }
 0x2a2   : > { %v4881_v16 = vadd.f32 %v4878_v38, %v4872_v56 }
 0x2ab   : > { %v7796_v28 = vpop.f32.mrf.mxu1 }
 0x2ac   : > { %v4879_v5 = vmul.f32 %v7796_v28, %v7796_v28 }
 0x2ad   : > { %v5561_v12 = vpop.f32.mrf.mxu1 }
 0x2ae   : > { %v7798_v61 = vpop.f32.mrf.mxu0  ;;  %v4882_v7 = vadd.f32 %v4879_v5, %v4873_v1 }
 0x2af   : > { %v4883_v36 = vmul.f32 %v7798_v61, %v7798_v61 }
 0x2b0   : > { %v5566_v34 = vpop.f32.mrf.mxu0 }
 0x2b1   : > { %v4886_v35 = vadd.f32 %v4883_v36, %v4880_v22 }
 0x2b7   : > { %v7800_v49 = vpop.f32.mrf.mxu1 }
 0x2b8   : > { %v4884_v45 = vmul.f32 %v7800_v49, %v7800_v49 }
 0x2b9   : > { %v7802_v50 = vpop.f32.mrf.mxu0  ;;  %v5571_v29 = vpop.f32.mrf.mxu1 }
 0x2ba   : > { %v4885_v27 = vmul.f32 %v7802_v50, %v7802_v50  ;;  %v4887_v44 = vadd.f32 %v4884_v45, %v4881_v16 }
 0x2bb   : > { %v5576_v53 = vpop.f32.mrf.mxu0 }
 0x2bc   : > { %v4888_v3 = vadd.f32 %v4885_v27, %v4882_v7 }
 0x2c3   : > { %v7804_v2 = vpop.f32.mrf.mxu1 }
 0x2c4   : > { %v7806_v40 = vpop.f32.mrf.mxu0  ;;  %v4889_v18 = vmul.f32 %v7804_v2, %v7804_v2 }
 0x2c5   : > { %v5581_v63 = vpop.f32.mrf.mxu1  ;;  %v4890_v51 = vmul.f32 %v7806_v40, %v7806_v40 }
 0x2c6   : > { %v5586_v41 = vpop.f32.mrf.mxu0  ;;  %v4892_v33 = vadd.f32 %v4889_v18, %v4886_v35 }
 0x2c7   : > { %v4893_v12 = vadd.f32 %v4890_v51, %v4887_v44 }
 0x2d0   : > { %v7808_v32 = vpop.f32.mrf.mxu1 }
 0x2d1   : > { %v7810_v39 = vpop.f32.mrf.mxu0  ;;  %v4891_v21 = vmul.f32 %v7808_v32, %v7808_v32 }
 0x2d2   : > { %v5591_v6 = vpop.f32.mrf.mxu1  ;;  %v4895_v60 = vmul.f32 %v7810_v39, %v7810_v39 }
 0x2d3   : > { %v5596_v20 = vpop.f32.mrf.mxu0  ;;  %v4894_v63 = vadd.f32 %v4891_v21, %v4888_v3 }
 0x2d4   : > { %v4898_v15 = vadd.f32 %v4895_v60, %v4892_v33 }
 0x2de   : > { %v7812_v47 = vpop.f32.mrf.mxu1 }
 0x2df   : > { %v4896_v34 = vmul.f32 %v7812_v47, %v7812_v47 }
 0x2e0   : > { %v5601_v43 = vpop.f32.mrf.mxu1 }
 0x2e1   : > { %v4899_v20 = vadd.f32 %v4896_v34, %v4893_v12 }
 0x2e2   : > { %v7814_v23 = vpop.f32.mrf.mxu0 }
 0x2e3   : > { %v4897_v41 = vmul.f32 %v7814_v23, %v7814_v23 }
 0x2e4   : > { %v5606_v31 = vpop.f32.mrf.mxu0 }
 0x2e5   : > { %v4900_v22 = vadd.f32 %v4897_v41, %v4894_v63 }
 0x2ee   : > { %v7816_v24 = vpop.f32.mrf.mxu1 }
 0x2ef   : > { %v7818_v4 = vpop.f32.mrf.mxu0  ;;  %v4901_v8 = vmul.f32 %v7816_v24, %v7816_v24 }
 0x2f0   : > { %v5611_v11 = vpop.f32.mrf.mxu1  ;;  %v4902_v43 = vmul.f32 %v7818_v4, %v7818_v4 }
 0x2f1   : > { %v5616_v10 = vpop.f32.mrf.mxu0  ;;  %v4904_v29 = vadd.f32 %v4901_v8, %v4898_v15 }
 0x2fa   : > { %v7820_v46 = vpop.f32.mrf.mxu1 }
 0x2fb   : > { %v7822_v62 = vpop.f32.mrf.mxu0  ;;  %v4903_v10 = vmul.f32 %v7820_v46, %v7820_v46 }
 0x2fc   : > { %v5621_v26 = vpop.f32.mrf.mxu1  ;;  %v4907_v19 = vmul.f32 %v7822_v62, %v7822_v62 }
 0x2fd   : > { %v5626_v58 = vpop.f32.mrf.mxu0 }
 0x2fe   : > { %v4910_v6 = vadd.f32 %v4907_v19, %v4904_v29 }
 0x304   : > { %v7834_v57 = vpop.f32.mrf.mxu1 }
 0x305   : > { %v7836_v30 = vpop.f32.mrf.mxu0  ;;  %v4908_v36 = vmul.f32 %v7834_v57, %v7834_v57 }
 0x306   : > { %v5631_v42 = vpop.f32.mrf.mxu1  ;;  %v4909_v56 = vmul.f32 %v7836_v30, %v7836_v30 }
 0x307   : > { %v5636_v54 = vpop.f32.mrf.mxu0  ;;  %v4905_v42 = vadd.f32 %v4902_v43, %v4899_v20 }
 0x308   : > { %v4906_v54 = vadd.f32 %v4903_v10, %v4900_v22 }
 0x309   : > { %v4911_v18 = vadd.f32 %v4908_v36, %v4905_v42 }
 0x30a   : > { %v4912_v16 = vadd.f32 %v4909_v56, %v4906_v54 }
 0x30c   : > { %v7852_v13 = vpop.f32.mrf.mxu1 }
 0x30d   : > { %v7854_v59 = vpop.f32.mrf.mxu0  ;;  %v4913_v53 = vmul.f32 %v7852_v13, %v7852_v13 }
 0x30e   : > { %v5641_v52 = vpop.f32.mrf.mxu1  ;;  %v4914_v1 = vmul.f32 %v7854_v59, %v7854_v59 }
 0x30f   : > { %v5646_v0 = vpop.f32.mrf.mxu0  ;;  %v4916_v26 = vadd.f32 %v4913_v53, %v4910_v6 }
 0x310   : > { %v4917_v27 = vadd.f32 %v4914_v1, %v4911_v18 }
 0x314   : > { %v7870_v31 = vpop.f32.mrf.mxu1 }
 0x315   : > { %v4721_v11 = vpop.f32.mrf.mxu0  ;;  %v4915_v5 = vmul.f32 %v7870_v31, %v7870_v31 }
 0x316   : > { %v4919_v58 = vmul.f32 %v4721_v11, %v4721_v11  ;;  %v5651_v48 = vpop.f32.mrf.mxu1 }
 0x317   : > { %v5656_v14 = vpop.f32.mrf.mxu0  ;;  %v4918_v33 = vadd.f32 %v4915_v5, %v4912_v16 }
 0x318   : > { %v4922_v38 = vadd.f32 %v4919_v58, %v4916_v26 }
 0x31a   : > { %v4925_v35 = vmax.f32 %v4922_v38, 1e-24 }
 0x31c   : > { %5740 = vrsqrt.f32 %v4925_v35  ;;  %v4794_v45 = vpop.f32.mrf.mxu1 }
 0x31d   : > { %v7883_v7 = vpop.f32.mrf.mxu0  ;;  %v4920_v60 = vmul.f32 %v4794_v45, %v4794_v45 }
 0x31e   : > { %v4921_v44 = vmul.f32 %v7883_v7, %v7883_v7  ;;  %v5661_v51 = vpop.f32.mrf.mxu1 }
 0x31f   : > { %v5666_v8 = vpop.f32.mrf.mxu0  ;;  %v4923_v52 = vadd.f32 %v4920_v60, %v4917_v27 }
 0x320   : > { %v4924_v0 = vadd.f32 %v4921_v44, %v4918_v33 }
 0x321   : > { %v4926_v3 = vmax.f32 %v4923_v52, 1e-24 }
 0x322   : > { %v4927_v21 = vmax.f32 %v4924_v0, 1e-24 }
 0x323   : > { %5742 = vrsqrt.f32 %v4926_v3 }
 0x324   : > { %5744 = vrsqrt.f32 %v4927_v21 }
 0x329   : > { %v5741_v15 = vpop.eup %5740 }
 0x32a   : > { %v4931_v19 = vmul.f32 %v5741_v15, %v7786_v25  ;;  %v4934_v12 = vmul.f32 %v5741_v15, %v7792_v37  ;;  %v4937_v34 = vmul.f32 %v5741_v15, %v7798_v61  ;;  %v4940_v29 = vmul.f32 %v5741_v15, %v7804_v2 }
 0x32b   : > { %v4943_v53 = vmul.f32 %v5741_v15, %v7810_v39  ;;  %v4946_v63 = vmul.f32 %v5741_v15, %v7816_v24  ;;  %v4949_v41 = vmul.f32 %v5741_v15, %v7822_v62  ;;  %v4952_v6 = vmul.f32 %v5741_v15, %v7852_v13 }
 0x32c   : > { %v4955_v20 = vmul.f32 %v5741_v15, %v4721_v11  ;;  %4959 = vst.msk [vmem:[%s7891_s18] sm:$0x3] %vm4958_vm8, %v4931_v19  ;;  %4962 = vst.msk [vmem:[%s7891_s18 + $0x6] sm:$0x3] %vm4958_vm8, %v4934_v12 }
 0x32d   : > { %4965 = vst.msk [vmem:[%s7891_s18 + $0xc] sm:$0x3] %vm4958_vm8, %v4937_v34  ;;  %4968 = vst.msk [vmem:[%s7891_s18 + $0x12] sm:$0x3] %vm4958_vm8, %v4940_v29 }
 0x32e   : > { %4971 = vst.msk [vmem:[%s7891_s18 + $0x18] sm:$0x3] %vm4958_vm8, %v4943_v53  ;;  %4974 = vst.msk [vmem:[%s7891_s18 + $0x1e] sm:$0x3] %vm4958_vm8, %v4946_v63 }
 0x32f   : > { %4977 = vst.msk [vmem:[%s7891_s18 + $0x24] sm:$0x3] %vm4958_vm8, %v4949_v41  ;;  %4980 = vst.msk [vmem:[%s7891_s18 + $0x2a] sm:$0x3] %vm4958_vm8, %v4952_v6 }
 0x330   : > { %4983 = vst.msk [vmem:[%s7891_s18 + $0x30] sm:$0x3] %vm4958_vm8, %v4955_v20  ;;  %v5743_v25 = vpop.eup %5742 }
 0x331   : > { %v5745_v37 = vpop.eup %5744  ;;  %v4932_v61 = vmul.f32 %v5743_v25, %v7788_v9  ;;  %v4935_v2 = vmul.f32 %v5743_v25, %v7794_v17  ;;  %v4938_v39 = vmul.f32 %v5743_v25, %v7800_v49  ;;  %v4941_v24 = vmul.f32 %v5743_v25, %v7806_v40 }
 0x332   : > { %v4944_v62 = vmul.f32 %v5743_v25, %v7812_v47  ;;  %v4947_v13 = vmul.f32 %v5743_v25, %v7818_v4  ;;  %v4950_v43 = vmul.f32 %v5743_v25, %v7834_v57  ;;  %v4953_v11 = vmul.f32 %v5743_v25, %v7854_v59 }
 0x333   : > { %v4956_v10 = vmul.f32 %v5743_v25, %v4794_v45  ;;  %4960 = vst.msk [vmem:[%s7891_s18 + $0x2] sm:$0x3] %vm4958_vm8, %v4932_v61  ;;  %4963 = vst.msk [vmem:[%s7891_s18 + $0x8] sm:$0x3] %vm4958_vm8, %v4935_v2  ;;  %v4933_v9 = vmul.f32 %v5745_v37, %v7790_v55  ;;  %v4936_v17 = vmul.f32 %v5745_v37, %v7796_v28 }
 0x334   : > { %4966 = vst.msk [vmem:[%s7891_s18 + $0xe] sm:$0x3] %vm4958_vm8, %v4938_v39  ;;  %4969 = vst.msk [vmem:[%s7891_s18 + $0x14] sm:$0x3] %vm4958_vm8, %v4941_v24  ;;  %v4939_v49 = vmul.f32 %v5745_v37, %v7802_v50  ;;  %v4942_v55 = vmul.f32 %v5745_v37, %v7808_v32  ;;  %v4945_v28 = vmul.f32 %v5745_v37, %v7814_v23 }
 0x335   : > { %4972 = vst.msk [vmem:[%s7891_s18 + $0x1a] sm:$0x3] %vm4958_vm8, %v4944_v62  ;;  %4975 = vst.msk [vmem:[%s7891_s18 + $0x20] sm:$0x3] %vm4958_vm8, %v4947_v13  ;;  %v4948_v40 = vmul.f32 %v5745_v37, %v7820_v46  ;;  %v4951_v50 = vmul.f32 %v5745_v37, %v7836_v30  ;;  %v4954_v47 = vmul.f32 %v5745_v37, %v7870_v31 }
 0x336   : > { %4978 = vst.msk [vmem:[%s7891_s18 + $0x26] sm:$0x3] %vm4958_vm8, %v4950_v43  ;;  %4981 = vst.msk [vmem:[%s7891_s18 + $0x2c] sm:$0x3] %vm4958_vm8, %v4953_v11  ;;  %v4957_v4 = vmul.f32 %v5745_v37, %v7883_v7 }
 0x337   : > { %4984 = vst.msk [vmem:[%s7891_s18 + $0x32] sm:$0x3] %vm4958_vm8, %v4956_v10  ;;  %4961 = vst.msk [vmem:[%s7891_s18 + $0x4] sm:$0x3] %vm4958_vm8, %v4933_v9 }
 0x338   : > { %4964 = vst.msk [vmem:[%s7891_s18 + $0xa] sm:$0x3] %vm4958_vm8, %v4936_v17  ;;  %4967 = vst.msk [vmem:[%s7891_s18 + $0x10] sm:$0x3] %vm4958_vm8, %v4939_v49 }
 0x339   : > { %4970 = vst.msk [vmem:[%s7891_s18 + $0x16] sm:$0x3] %vm4958_vm8, %v4942_v55  ;;  %4973 = vst.msk [vmem:[%s7891_s18 + $0x1c] sm:$0x3] %vm4958_vm8, %v4945_v28 }
 0x33a   : > { %4976 = vst.msk [vmem:[%s7891_s18 + $0x22] sm:$0x3] %vm4958_vm8, %v4948_v40  ;;  %4979 = vst.msk [vmem:[%s7891_s18 + $0x28] sm:$0x3] %vm4958_vm8, %v4951_v50 }
 0x33b   : > { %4982 = vst.msk [vmem:[%s7891_s18 + $0x2e] sm:$0x3] %vm4958_vm8, %v4954_v47  ;;  %4985 = vst.msk [vmem:[%s7891_s18 + $0x34] sm:$0x3] %vm4958_vm8, %v4957_v4 }
 0x33c PF: > { %p14_p0 = scmp.ge.s32.totalorder %s5891_s17, 4   ;;  %s8463_s12 = smov %s5830_s13 }
 0x33d   : > { %s8464_s13 = smov %s5834_s14  ;;  %s8465_s14 = smov %s5901_s20 }
 0x33e   : > { %s8466_s15 = smov %s5891_s17  ;;  %16 = sbr.rel (!%p14_p0) target bundleno = 4 (0x4), region = 76 }
 0x343   :  { %5007 = vsyncpa [#allocation3], 1 }
 0x344   :  { %5009 = vsyncpa [#allocation3 + $0x1], 1 }
 0x345   :  { %5010 = vsyncpa [#allocation5], 1 }

</bundles_post_ra>
